<compile_context>
chip_gen: v7x
topology: tpu7x:2x2x1
jax: 0.10.0
libtpu: 0.0.40
codegen_flags: <defaults>
</compile_context>

<pallas_src>
import math

import jax
import jax.numpy as jnp
from jax import lax
from jax.experimental import pallas as pl
from jax.experimental.pallas import tpu as pltpu

# ---------------- small BERT config ----------------
VOCAB = 64        # vocab size (synthetic)
MAX_POS = 32      # max position embeddings
TYPE_VOCAB = 2
H = 32            # hidden size
NH = 4            # attention heads
HD = H // NH      # head dim
FF = 64           # intermediate (FFN) size
L = 2             # number of encoder layers
NUM_LABELS = 7
LANE = 128        # lane-dense padded class dim
LN_EPS = 1e-12
NEG_INF = -1e9    # additive mask bias / logit pad (stand-in for finfo(f32).min)


# ---------------- in-kernel helpers ----------------
def _ln2d(x, g, b):
    # x: (R, H); g, b: (1, H)
    mean = jnp.mean(x, axis=-1, keepdims=True)
    var = jnp.mean(jnp.square(x - mean), axis=-1, keepdims=True)
    return (x - mean) * lax.rsqrt(var + LN_EPS) * g + b


def _gelu_exact(x):
    # HF BERT default activation "gelu" (erf-based).  Kept exact for parity with
    # the PyTorch reference; switch to tanh-approx only if the tolerance allows.
    return 0.5 * x * (1.0 + lax.erf(x * (1.0 / math.sqrt(2.0))))


# ---------------- fused whole-forward kernel (single invocation) -------------
def _bert_fused_kernel(ids_ref, bias_ref, labels_ref,
                       wemb_ref, pemb_ref, temb_ref, elng_ref, elnb_ref,
                       wqkv_ref, bqkv_ref, wo_ref, bo_ref,
                       ln1g_ref, ln1b_ref, w1_ref, b1_ref,
                       w2_ref, b2_ref, ln2g_ref, ln2b_ref,
                       wc_ref, bc_ref,
                       logits_ref, stats_ref):
    BS = ids_ref.shape[0]                 # folded batch*seq rows
    vocab, hidden = wemb_ref.shape
    n_layers = wqkv_ref.shape[0]

    # ---- embeddings: one-hot gather via MXU + position + token-type, then LN ----
    ids = ids_ref[...]                                                # (BS, 1) i32
    onehot = (ids == lax.broadcasted_iota(jnp.int32, (BS, vocab), 1)).astype(jnp.float32)
    x = jnp.dot(onehot, wemb_ref[...], preferred_element_type=jnp.float32)
    x = x + pemb_ref[...] + temb_ref[...]
    x = _ln2d(x, elng_ref[...], elnb_ref[...])                        # (BS, H)

    # additive attention bias (block-diagonal across batch + key padding),
    # built once in the wrapper and hoisted over all layers/heads.
    bias = bias_ref[...]                                              # (BS, BS)
    scale = 1.0 / math.sqrt(HD)

    for l in range(n_layers):                                         # static unroll
        # ---- fused QKV projection: one lane-dense (BS,H)x(H,3H) matmul ----
        qkv = jnp.dot(x, wqkv_ref[l], preferred_element_type=jnp.float32) + bqkv_ref[l]

        # ---- per-head attention (static head loop, independent chains) ----
        ctx_heads = []
        for h in range(NH):
            q_h = qkv[:, h * HD:(h + 1) * HD]                         # (BS, HD)
            k_h = qkv[:, hidden + h * HD: hidden + (h + 1) * HD]
            v_h = qkv[:, 2 * hidden + h * HD: 2 * hidden + (h + 1) * HD]
            # q·kᵀ without an explicit transpose
            s = lax.dot_general(q_h, k_h,
                                dimension_numbers=(((1,), (1,)), ((), ())),
                                preferred_element_type=jnp.float32) * scale + bias
            s = s - jnp.max(s, axis=-1, keepdims=True)
            p = jnp.exp(s)
            p = p / jnp.sum(p, axis=-1, keepdims=True)                # exact divide
            ctx_heads.append(jnp.dot(p, v_h, preferred_element_type=jnp.float32))

        # ---- head concat (lane dim) + single (BS,H)x(H,H) output projection ----
        ctx = jnp.concatenate(ctx_heads, axis=-1)                     # (BS, H)
        attn = jnp.dot(ctx, wo_ref[l], preferred_element_type=jnp.float32) + bo_ref[l]

        h1 = _ln2d(x + attn, ln1g_ref[l], ln1b_ref[l])

        ff = jnp.dot(h1, w1_ref[l], preferred_element_type=jnp.float32) + b1_ref[l]
        ff = _gelu_exact(ff)
        ff = jnp.dot(ff, w2_ref[l], preferred_element_type=jnp.float32) + b2_ref[l]
        x = _ln2d(h1 + ff, ln2g_ref[l], ln2b_ref[l])

    # ---- token-classification head, lane-dense (padded to 128 classes) ----
    logits = jnp.dot(x, wc_ref[...], preferred_element_type=jnp.float32) + bc_ref[...]
    logits_ref[...] = logits                                          # (BS, 128)

    # ---- masked cross-entropy partial sums (whole folded batch) ----
    # labels were pre-masked in the wrapper: label = -100 wherever mask == 0
    labels = labels_ref[...]                                          # (BS, 1) i32
    valid = labels != -100
    safe = jnp.where(valid, labels, 0)
    m = jnp.max(logits, axis=-1, keepdims=True)
    # padded classes carry bias NEG_INF -> exp(.-m) == 0, so the 128-wide lse
    # equals the 7-class lse exactly.
    lse = jnp.log(jnp.sum(jnp.exp(logits - m), axis=-1, keepdims=True)) + m
    onehot_lab = (safe == lax.broadcasted_iota(jnp.int32, (BS, LANE), 1)).astype(jnp.float32)
    true_logit = jnp.sum(logits * onehot_lab, axis=-1, keepdims=True)
    validf = valid.astype(jnp.float32)
    nll_sum = jnp.sum((lse - true_logit) * validf)
    cnt = jnp.sum(validf)
    lane = lax.broadcasted_iota(jnp.int32, (1, LANE), 1)
    stats_ref[...] = jnp.where(lane == 0, nll_sum, jnp.where(lane == 1, cnt, 0.0))


# ---------------- pallas_call wrapper ----------------
def _full_spec(shape):
    n = len(shape)
    return pl.BlockSpec(shape, lambda i, _n=n: (0,) * _n)


def bert_forward(params, input_ids, attention_mask, labels):
    """Equivalent of BertModel.forward(input_id, mask, label) -> (loss, logits)."""
    B, S = input_ids.shape
    BS = B * S

    # ---- trace-time weight re-layout: fused QKV columns, stacked layers ----
    layers = params['layers']
    wqkv = jnp.stack([jnp.concatenate([lp['wq'], lp['wk'], lp['wv']], axis=-1)
                      for lp in layers])                               # (L, H, 3H)
    bqkv = jnp.stack([jnp.concatenate([lp['bq'], lp['bk'], lp['bv']]).reshape(1, 3 * H)
                      for lp in layers])                               # (L, 1, 3H)
    wo = jnp.stack([lp['wo'] for lp in layers])                        # (L, H, H)
    bo = jnp.stack([lp['bo'].reshape(1, H) for lp in layers])
    ln1g = jnp.stack([lp['ln1_g'].reshape(1, H) for lp in layers])
    ln1b = jnp.stack([lp['ln1_b'].reshape(1, H) for lp in layers])
    w1 = jnp.stack([lp['w1'] for lp in layers])                        # (L, H, FF)
    b1 = jnp.stack([lp['b1'].reshape(1, FF) for lp in layers])
    w2 = jnp.stack([lp['w2'] for lp in layers])                        # (L, FF, H)
    b2 = jnp.stack([lp['b2'].reshape(1, H) for lp in layers])
    ln2g = jnp.stack([lp['ln2_g'].reshape(1, H) for lp in layers])
    ln2b = jnp.stack([lp['ln2_b'].reshape(1, H) for lp in layers])

    # classifier padded lane-dense to 128 columns; pad bias = NEG_INF so the
    # in-kernel softmax/lse over 128 lanes matches the 7-class result.
    wc_pad = jnp.zeros((H, LANE), jnp.float32).at[:, :NUM_LABELS].set(params['cls_w'])
    bc_pad = jnp.full((1, LANE), NEG_INF, jnp.float32).at[0, :NUM_LABELS].set(params['cls_b'])

    # ---- fold batch into rows: ids/labels (BS,1); block-diag attention bias ----
    ids = input_ids.astype(jnp.int32).reshape(BS, 1)
    # old-HF BertForTokenClassification semantics: active tokens = mask==1;
    # inactive labels replaced by ignore_index (-100).
    active_labels = jnp.where(attention_mask == 1, labels, -100).astype(jnp.int32)
    active_labels = active_labels.reshape(BS, 1)

    batch_idx = jnp.repeat(jnp.arange(B, dtype=jnp.int32), S)          # (BS,)
    same_batch = batch_idx[:, None] == batch_idx[None, :]
    key_valid = (attention_mask.reshape(BS) == 1)
    bias = jnp.where(same_batch & key_valid[None, :], 0.0, NEG_INF).astype(jnp.float32)

    pemb = jnp.tile(params['pos_emb'][:S], (B, 1))                     # (BS, H)
    temb = params['type_emb'][0:1]                                     # (1, H)
    elng = params['emb_ln_g'].reshape(1, H)
    elnb = params['emb_ln_b'].reshape(1, H)

    args = [ids, bias, active_labels,
            params['word_emb'], pemb, temb, elng, elnb,
            wqkv, bqkv, wo, bo, ln1g, ln1b, w1, b1, w2, b2, ln2g, ln2b,
            wc_pad, bc_pad]

    in_specs = [_full_spec(a.shape) for a in args]
    out_shapes = (jax.ShapeDtypeStruct((BS, LANE), jnp.float32),
                  jax.ShapeDtypeStruct((1, LANE), jnp.float32))
    out_specs = (pl.BlockSpec((BS, LANE), lambda i: (0, 0)),
                 pl.BlockSpec((1, LANE), lambda i: (0, 0)))

    # Single invocation (grid of size 1): at these shapes the folded version
    # beats the 2-TC split (each core would pay its own prologue + weight DMA).
    logits_pad, stats = pl.pallas_call(
        _bert_fused_kernel,
        out_shape=out_shapes,
        grid=(1,),
        in_specs=in_specs,
        out_specs=out_specs,
    )(*args)

    nll_total = stats[0, 0]
    cnt_total = stats[0, 1]
    loss = nll_total / jnp.maximum(cnt_total, 1.0)       # guard: no valid tokens -> 0
    logits = logits_pad.reshape(B, S, LANE)[:, :, :NUM_LABELS]
    return loss, logits


# ---------------- parameters ----------------
def init_params(seed=0):
    keys = iter(jax.random.split(jax.random.PRNGKey(seed), 64))

    def w(shape):
        return jax.random.normal(next(keys), shape, jnp.float32) * 0.02

    params = {
        'word_emb': w((VOCAB, H)),
        'pos_emb': w((MAX_POS, H)),
        'type_emb': w((TYPE_VOCAB, H)),
        'emb_ln_g': jnp.ones((H,), jnp.float32),
        'emb_ln_b': jnp.zeros((H,), jnp.float32),
        'cls_w': w((H, NUM_LABELS)),
        'cls_b': jnp.zeros((NUM_LABELS,), jnp.float32),
        'layers': [],
    }
    for _ in range(L):
        params['layers'].append({
            'wq': w((H, H)), 'bq': jnp.zeros((H,), jnp.float32),
            'wk': w((H, H)), 'bk': jnp.zeros((H,), jnp.float32),
            'wv': w((H, H)), 'bv': jnp.zeros((H,), jnp.float32),
            'wo': w((H, H)), 'bo': jnp.zeros((H,), jnp.float32),
            'ln1_g': jnp.ones((H,), jnp.float32), 'ln1_b': jnp.zeros((H,), jnp.float32),
            'w1': w((H, FF)), 'b1': jnp.zeros((FF,), jnp.float32),
            'w2': w((FF, H)), 'b2': jnp.zeros((H,), jnp.float32),
            'ln2_g': jnp.ones((H,), jnp.float32), 'ln2_b': jnp.zeros((H,), jnp.float32),
        })
    return params


if __name__ == "__main__":
    B, S = 2, 8
    params = init_params(0)

    key = jax.random.PRNGKey(0)
    k_ids, k_lab = jax.random.split(key)
    input_ids = jax.random.randint(k_ids, (B, S), 0, VOCAB, dtype=jnp.int32)
    attention_mask = jnp.array([[1, 1, 1, 1, 1, 1, 1, 1],
                                [1, 1, 1, 1, 1, 1, 0, 0]], dtype=jnp.int32)
    labels = jax.random.randint(k_lab, (B, S), 0, NUM_LABELS, dtype=jnp.int32)
    labels = jnp.where(attention_mask == 1, labels, -100)   # NER-style padding labels

    loss, logits = bert_forward(params, input_ids, attention_mask, labels)
    jax.block_until_ready((loss, logits))
    assert logits.shape == (B, S, NUM_LABELS)
    assert bool(jnp.isfinite(loss))
    print("KERNEL_OK")
</pallas_src>

<mosaic_0001>
module attributes {stable_mosaic.version = 11 : i64} {
  func.func @_bert_fused_kernel(%arg0: i32, %arg1: memref<16x1xi32, #tpu.memory_space<vmem>>, %arg2: memref<16x16xf32, #tpu.memory_space<vmem>>, %arg3: memref<16x1xi32, #tpu.memory_space<vmem>>, %arg4: memref<64x32xf32, #tpu.memory_space<vmem>>, %arg5: memref<16x32xf32, #tpu.memory_space<vmem>>, %arg6: memref<1x32xf32, #tpu.memory_space<vmem>>, %arg7: memref<1x32xf32, #tpu.memory_space<vmem>>, %arg8: memref<1x32xf32, #tpu.memory_space<vmem>>, %arg9: memref<2x32x96xf32, #tpu.memory_space<vmem>>, %arg10: memref<2x1x96xf32, #tpu.memory_space<vmem>>, %arg11: memref<2x32x32xf32, #tpu.memory_space<vmem>>, %arg12: memref<2x1x32xf32, #tpu.memory_space<vmem>>, %arg13: memref<2x1x32xf32, #tpu.memory_space<vmem>>, %arg14: memref<2x1x32xf32, #tpu.memory_space<vmem>>, %arg15: memref<2x32x64xf32, #tpu.memory_space<vmem>>, %arg16: memref<2x1x64xf32, #tpu.memory_space<vmem>>, %arg17: memref<2x64x32xf32, #tpu.memory_space<vmem>>, %arg18: memref<2x1x32xf32, #tpu.memory_space<vmem>>, %arg19: memref<2x1x32xf32, #tpu.memory_space<vmem>>, %arg20: memref<2x1x32xf32, #tpu.memory_space<vmem>>, %arg21: memref<32x128xf32, #tpu.memory_space<vmem>>, %arg22: memref<1x128xf32, #tpu.memory_space<vmem>>, %arg23: memref<16x128xf32, #tpu.memory_space<vmem>>, %arg24: memref<1x128xf32, #tpu.memory_space<vmem>>) attributes {dimension_semantics = [#tpu.dimension_semantics<arbitrary>], iteration_bounds = array<i64: 1>, scalar_prefetch = 0 : i64, scratch_operands = 0 : i64, tpu.core_type = #tpu.core_type<tc>, window_params = [{pipeline_mode = #tpu.pipeline_mode<synchronous>, transform_indices = @transform_0, window_bounds = array<i64: 16, 1>}, {pipeline_mode = #tpu.pipeline_mode<synchronous>, transform_indices = @transform_1, window_bounds = array<i64: 16, 16>}, {pipeline_mode = #tpu.pipeline_mode<synchronous>, transform_indices = @transform_2, window_bounds = array<i64: 16, 1>}, {pipeline_mode = #tpu.pipeline_mode<synchronous>, transform_indices = @transform_3, window_bounds = array<i64: 64, 32>}, {pipeline_mode = #tpu.pipeline_mode<synchronous>, transform_indices = @transform_4, window_bounds = array<i64: 16, 32>}, {pipeline_mode = #tpu.pipeline_mode<synchronous>, transform_indices = @transform_5, window_bounds = array<i64: 1, 32>}, {pipeline_mode = #tpu.pipeline_mode<synchronous>, transform_indices = @transform_6, window_bounds = array<i64: 1, 32>}, {pipeline_mode = #tpu.pipeline_mode<synchronous>, transform_indices = @transform_7, window_bounds = array<i64: 1, 32>}, {pipeline_mode = #tpu.pipeline_mode<synchronous>, transform_indices = @transform_8, window_bounds = array<i64: 2, 32, 96>}, {pipeline_mode = #tpu.pipeline_mode<synchronous>, transform_indices = @transform_9, window_bounds = array<i64: 2, 1, 96>}, {pipeline_mode = #tpu.pipeline_mode<synchronous>, transform_indices = @transform_10, window_bounds = array<i64: 2, 32, 32>}, {pipeline_mode = #tpu.pipeline_mode<synchronous>, transform_indices = @transform_11, window_bounds = array<i64: 2, 1, 32>}, {pipeline_mode = #tpu.pipeline_mode<synchronous>, transform_indices = @transform_12, window_bounds = array<i64: 2, 1, 32>}, {pipeline_mode = #tpu.pipeline_mode<synchronous>, transform_indices = @transform_13, window_bounds = array<i64: 2, 1, 32>}, {pipeline_mode = #tpu.pipeline_mode<synchronous>, transform_indices = @transform_14, window_bounds = array<i64: 2, 32, 64>}, {pipeline_mode = #tpu.pipeline_mode<synchronous>, transform_indices = @transform_15, window_bounds = array<i64: 2, 1, 64>}, {pipeline_mode = #tpu.pipeline_mode<synchronous>, transform_indices = @transform_16, window_bounds = array<i64: 2, 64, 32>}, {pipeline_mode = #tpu.pipeline_mode<synchronous>, transform_indices = @transform_17, window_bounds = array<i64: 2, 1, 32>}, {pipeline_mode = #tpu.pipeline_mode<synchronous>, transform_indices = @transform_18, window_bounds = array<i64: 2, 1, 32>}, {pipeline_mode = #tpu.pipeline_mode<synchronous>, transform_indices = @transform_19, window_bounds = array<i64: 2, 1, 32>}, {pipeline_mode = #tpu.pipeline_mode<synchronous>, transform_indices = @transform_20, window_bounds = array<i64: 32, 128>}, {pipeline_mode = #tpu.pipeline_mode<synchronous>, transform_indices = @transform_21, window_bounds = array<i64: 1, 128>}, {pipeline_mode = #tpu.pipeline_mode<synchronous>, transform_indices = @transform_22, window_bounds = array<i64: 16, 128>}, {pipeline_mode = #tpu.pipeline_mode<synchronous>, transform_indices = @transform_23, window_bounds = array<i64: 1, 128>}]} {
    %c0 = arith.constant 0 : index
    %c0_0 = arith.constant 0 : index
    %0 = vector.load %arg1[%c0, %c0_0] : memref<16x1xi32, #tpu.memory_space<vmem>>, vector<16x1xi32>
    %1 = tpu.iota {dimensions = array<i32: 1>} : vector<16x64xi32>
    %2 = vector.broadcast %0 : vector<16x1xi32> to vector<16x64xi32>
    %3 = arith.cmpi eq, %2, %1 : vector<16x64xi32>
    %4 = arith.extui %3 : vector<16x64xi1> to vector<16x64xi32>
    %5 = arith.sitofp %4 : vector<16x64xi32> to vector<16x64xf32>
    %c0_1 = arith.constant 0 : index
    %c0_2 = arith.constant 0 : index
    %6 = vector.load %arg4[%c0_1, %c0_2] : memref<64x32xf32, #tpu.memory_space<vmem>>, vector<64x32xf32>
    %cst = arith.constant dense<0.000000e+00> : vector<16x32xf32>
    %7 = tpu.matmul %5, %6, %cst {dimension_numbers = #tpu.dot_dimension_numbers<[1], [0], [0], [1], [0, 0, 1, 1], [], []>} : vector<16x64xf32>, vector<64x32xf32>, vector<16x32xf32> -> vector<16x32xf32>
    %c0_3 = arith.constant 0 : index
    %c0_4 = arith.constant 0 : index
    %8 = vector.load %arg5[%c0_3, %c0_4] : memref<16x32xf32, #tpu.memory_space<vmem>>, vector<16x32xf32>
    %9 = arith.addf %7, %8 : vector<16x32xf32>
    %c0_5 = arith.constant 0 : index
    %c0_6 = arith.constant 0 : index
    %10 = vector.load %arg6[%c0_5, %c0_6] : memref<1x32xf32, #tpu.memory_space<vmem>>, vector<1x32xf32>
    %11 = vector.broadcast %10 : vector<1x32xf32> to vector<16x32xf32>
    %12 = arith.addf %9, %11 : vector<16x32xf32>
    %c0_7 = arith.constant 0 : index
    %c0_8 = arith.constant 0 : index
    %13 = vector.load %arg7[%c0_7, %c0_8] : memref<1x32xf32, #tpu.memory_space<vmem>>, vector<1x32xf32>
    %c0_9 = arith.constant 0 : index
    %c0_10 = arith.constant 0 : index
    %14 = vector.load %arg8[%c0_9, %c0_10] : memref<1x32xf32, #tpu.memory_space<vmem>>, vector<1x32xf32>
    %cst_11 = arith.constant dense<0.000000e+00> : vector<16xf32>
    %15 = vector.multi_reduction <add>, %12, %cst_11 [1] : vector<16x32xf32> to vector<16xf32>
    %16 = vector.shape_cast %15 : vector<16xf32> to vector<16x1xf32>
    %cst_12 = arith.constant 3.200000e+01 : f32
    %17 = vector.broadcast %cst_12 : f32 to vector<16x1xf32>
    %18 = arith.divf %16, %17 : vector<16x1xf32>
    %19 = vector.broadcast %18 : vector<16x1xf32> to vector<16x32xf32>
    %20 = arith.subf %12, %19 : vector<16x32xf32>
    %21 = arith.mulf %20, %20 : vector<16x32xf32>
    %cst_13 = arith.constant dense<0.000000e+00> : vector<16xf32>
    %22 = vector.multi_reduction <add>, %21, %cst_13 [1] : vector<16x32xf32> to vector<16xf32>
    %23 = vector.shape_cast %22 : vector<16xf32> to vector<16x1xf32>
    %cst_14 = arith.constant 3.200000e+01 : f32
    %24 = vector.broadcast %cst_14 : f32 to vector<16x1xf32>
    %25 = arith.divf %23, %24 : vector<16x1xf32>
    %26 = vector.broadcast %18 : vector<16x1xf32> to vector<16x32xf32>
    %27 = arith.subf %12, %26 : vector<16x32xf32>
    %cst_15 = arith.constant 9.99999996E-13 : f32
    %28 = vector.broadcast %cst_15 : f32 to vector<16x1xf32>
    %29 = arith.addf %25, %28 : vector<16x1xf32>
    %30 = math.rsqrt %29 : vector<16x1xf32>
    %31 = vector.broadcast %30 : vector<16x1xf32> to vector<16x32xf32>
    %32 = arith.mulf %27, %31 : vector<16x32xf32>
    %33 = vector.broadcast %13 : vector<1x32xf32> to vector<16x32xf32>
    %34 = arith.mulf %32, %33 : vector<16x32xf32>
    %35 = vector.broadcast %14 : vector<1x32xf32> to vector<16x32xf32>
    %36 = arith.addf %34, %35 : vector<16x32xf32>
    %c0_16 = arith.constant 0 : index
    %c0_17 = arith.constant 0 : index
    %37 = vector.load %arg2[%c0_16, %c0_17] : memref<16x16xf32, #tpu.memory_space<vmem>>, vector<16x16xf32>
    %c0_18 = arith.constant 0 : index
    %c0_19 = arith.constant 0 : index
    %c0_20 = arith.constant 0 : index
    %38 = vector.load %arg9[%c0_18, %c0_19, %c0_20] : memref<2x32x96xf32, #tpu.memory_space<vmem>>, vector<1x32x96xf32>
    %39 = vector.shape_cast %38 : vector<1x32x96xf32> to vector<32x96xf32>
    %cst_21 = arith.constant dense<0.000000e+00> : vector<16x96xf32>
    %40 = tpu.matmul %36, %39, %cst_21 {dimension_numbers = #tpu.dot_dimension_numbers<[1], [0], [0], [1], [0, 0, 1, 1], [], []>} : vector<16x32xf32>, vector<32x96xf32>, vector<16x96xf32> -> vector<16x96xf32>
    %c0_22 = arith.constant 0 : index
    %c0_23 = arith.constant 0 : index
    %c0_24 = arith.constant 0 : index
    %41 = vector.load %arg10[%c0_22, %c0_23, %c0_24] : memref<2x1x96xf32, #tpu.memory_space<vmem>>, vector<1x1x96xf32>
    %42 = vector.shape_cast %41 : vector<1x1x96xf32> to vector<1x96xf32>
    %43 = vector.broadcast %42 : vector<1x96xf32> to vector<16x96xf32>
    %44 = arith.addf %40, %43 : vector<16x96xf32>
    %45 = vector.extract_strided_slice %44 {offsets = [0, 0], sizes = [16, 8], strides = [1, 1]} : vector<16x96xf32> to vector<16x8xf32>
    %46 = vector.extract_strided_slice %44 {offsets = [0, 32], sizes = [16, 8], strides = [1, 1]} : vector<16x96xf32> to vector<16x8xf32>
    %47 = vector.extract_strided_slice %44 {offsets = [0, 64], sizes = [16, 8], strides = [1, 1]} : vector<16x96xf32> to vector<16x8xf32>
    %cst_25 = arith.constant dense<0.000000e+00> : vector<16x16xf32>
    %48 = tpu.matmul %45, %46, %cst_25 {dimension_numbers = #tpu.dot_dimension_numbers<[1], [1], [0], [0], [0, 0, 1, 0], [], []>} : vector<16x8xf32>, vector<16x8xf32>, vector<16x16xf32> -> vector<16x16xf32>
    %cst_26 = arith.constant 0.353553385 : f32
    %49 = vector.broadcast %cst_26 : f32 to vector<16x16xf32>
    %50 = arith.mulf %48, %49 : vector<16x16xf32>
    %51 = arith.addf %50, %37 : vector<16x16xf32>
    %cst_27 = arith.constant dense<0xFF800000> : vector<16xf32>
    %52 = vector.multi_reduction <maximumf>, %51, %cst_27 [1] : vector<16x16xf32> to vector<16xf32>
    %53 = vector.shape_cast %52 : vector<16xf32> to vector<16x1xf32>
    %54 = vector.broadcast %53 : vector<16x1xf32> to vector<16x16xf32>
    %55 = arith.subf %51, %54 : vector<16x16xf32>
    %56 = math.exp %55 : vector<16x16xf32>
    %cst_28 = arith.constant dense<0.000000e+00> : vector<16xf32>
    %57 = vector.multi_reduction <add>, %56, %cst_28 [1] : vector<16x16xf32> to vector<16xf32>
    %58 = vector.shape_cast %57 : vector<16xf32> to vector<16x1xf32>
    %59 = vector.broadcast %58 : vector<16x1xf32> to vector<16x16xf32>
    %60 = arith.divf %56, %59 : vector<16x16xf32>
    %cst_29 = arith.constant dense<0.000000e+00> : vector<16x8xf32>
    %61 = tpu.matmul %60, %47, %cst_29 {dimension_numbers = #tpu.dot_dimension_numbers<[1], [0], [0], [1], [0, 0, 1, 1], [], []>} : vector<16x16xf32>, vector<16x8xf32>, vector<16x8xf32> -> vector<16x8xf32>
    %62 = vector.extract_strided_slice %44 {offsets = [0, 8], sizes = [16, 8], strides = [1, 1]} : vector<16x96xf32> to vector<16x8xf32>
    %63 = vector.extract_strided_slice %44 {offsets = [0, 40], sizes = [16, 8], strides = [1, 1]} : vector<16x96xf32> to vector<16x8xf32>
    %64 = vector.extract_strided_slice %44 {offsets = [0, 72], sizes = [16, 8], strides = [1, 1]} : vector<16x96xf32> to vector<16x8xf32>
    %cst_30 = arith.constant dense<0.000000e+00> : vector<16x16xf32>
    %65 = tpu.matmul %62, %63, %cst_30 {dimension_numbers = #tpu.dot_dimension_numbers<[1], [1], [0], [0], [0, 0, 1, 0], [], []>} : vector<16x8xf32>, vector<16x8xf32>, vector<16x16xf32> -> vector<16x16xf32>
    %cst_31 = arith.constant 0.353553385 : f32
    %66 = vector.broadcast %cst_31 : f32 to vector<16x16xf32>
    %67 = arith.mulf %65, %66 : vector<16x16xf32>
    %68 = arith.addf %67, %37 : vector<16x16xf32>
    %cst_32 = arith.constant dense<0xFF800000> : vector<16xf32>
    %69 = vector.multi_reduction <maximumf>, %68, %cst_32 [1] : vector<16x16xf32> to vector<16xf32>
    %70 = vector.shape_cast %69 : vector<16xf32> to vector<16x1xf32>
    %71 = vector.broadcast %70 : vector<16x1xf32> to vector<16x16xf32>
    %72 = arith.subf %68, %71 : vector<16x16xf32>
    %73 = math.exp %72 : vector<16x16xf32>
    %cst_33 = arith.constant dense<0.000000e+00> : vector<16xf32>
    %74 = vector.multi_reduction <add>, %73, %cst_33 [1] : vector<16x16xf32> to vector<16xf32>
    %75 = vector.shape_cast %74 : vector<16xf32> to vector<16x1xf32>
    %76 = vector.broadcast %75 : vector<16x1xf32> to vector<16x16xf32>
    %77 = arith.divf %73, %76 : vector<16x16xf32>
    %cst_34 = arith.constant dense<0.000000e+00> : vector<16x8xf32>
    %78 = tpu.matmul %77, %64, %cst_34 {dimension_numbers = #tpu.dot_dimension_numbers<[1], [0], [0], [1], [0, 0, 1, 1], [], []>} : vector<16x16xf32>, vector<16x8xf32>, vector<16x8xf32> -> vector<16x8xf32>
    %79 = vector.extract_strided_slice %44 {offsets = [0, 16], sizes = [16, 8], strides = [1, 1]} : vector<16x96xf32> to vector<16x8xf32>
    %80 = vector.extract_strided_slice %44 {offsets = [0, 48], sizes = [16, 8], strides = [1, 1]} : vector<16x96xf32> to vector<16x8xf32>
    %81 = vector.extract_strided_slice %44 {offsets = [0, 80], sizes = [16, 8], strides = [1, 1]} : vector<16x96xf32> to vector<16x8xf32>
    %cst_35 = arith.constant dense<0.000000e+00> : vector<16x16xf32>
    %82 = tpu.matmul %79, %80, %cst_35 {dimension_numbers = #tpu.dot_dimension_numbers<[1], [1], [0], [0], [0, 0, 1, 0], [], []>} : vector<16x8xf32>, vector<16x8xf32>, vector<16x16xf32> -> vector<16x16xf32>
    %cst_36 = arith.constant 0.353553385 : f32
    %83 = vector.broadcast %cst_36 : f32 to vector<16x16xf32>
    %84 = arith.mulf %82, %83 : vector<16x16xf32>
    %85 = arith.addf %84, %37 : vector<16x16xf32>
    %cst_37 = arith.constant dense<0xFF800000> : vector<16xf32>
    %86 = vector.multi_reduction <maximumf>, %85, %cst_37 [1] : vector<16x16xf32> to vector<16xf32>
    %87 = vector.shape_cast %86 : vector<16xf32> to vector<16x1xf32>
    %88 = vector.broadcast %87 : vector<16x1xf32> to vector<16x16xf32>
    %89 = arith.subf %85, %88 : vector<16x16xf32>
    %90 = math.exp %89 : vector<16x16xf32>
    %cst_38 = arith.constant dense<0.000000e+00> : vector<16xf32>
    %91 = vector.multi_reduction <add>, %90, %cst_38 [1] : vector<16x16xf32> to vector<16xf32>
    %92 = vector.shape_cast %91 : vector<16xf32> to vector<16x1xf32>
    %93 = vector.broadcast %92 : vector<16x1xf32> to vector<16x16xf32>
    %94 = arith.divf %90, %93 : vector<16x16xf32>
    %cst_39 = arith.constant dense<0.000000e+00> : vector<16x8xf32>
    %95 = tpu.matmul %94, %81, %cst_39 {dimension_numbers = #tpu.dot_dimension_numbers<[1], [0], [0], [1], [0, 0, 1, 1], [], []>} : vector<16x16xf32>, vector<16x8xf32>, vector<16x8xf32> -> vector<16x8xf32>
    %96 = vector.extract_strided_slice %44 {offsets = [0, 24], sizes = [16, 8], strides = [1, 1]} : vector<16x96xf32> to vector<16x8xf32>
    %97 = vector.extract_strided_slice %44 {offsets = [0, 56], sizes = [16, 8], strides = [1, 1]} : vector<16x96xf32> to vector<16x8xf32>
    %98 = vector.extract_strided_slice %44 {offsets = [0, 88], sizes = [16, 8], strides = [1, 1]} : vector<16x96xf32> to vector<16x8xf32>
    %cst_40 = arith.constant dense<0.000000e+00> : vector<16x16xf32>
    %99 = tpu.matmul %96, %97, %cst_40 {dimension_numbers = #tpu.dot_dimension_numbers<[1], [1], [0], [0], [0, 0, 1, 0], [], []>} : vector<16x8xf32>, vector<16x8xf32>, vector<16x16xf32> -> vector<16x16xf32>
    %cst_41 = arith.constant 0.353553385 : f32
    %100 = vector.broadcast %cst_41 : f32 to vector<16x16xf32>
    %101 = arith.mulf %99, %100 : vector<16x16xf32>
    %102 = arith.addf %101, %37 : vector<16x16xf32>
    %cst_42 = arith.constant dense<0xFF800000> : vector<16xf32>
    %103 = vector.multi_reduction <maximumf>, %102, %cst_42 [1] : vector<16x16xf32> to vector<16xf32>
    %104 = vector.shape_cast %103 : vector<16xf32> to vector<16x1xf32>
    %105 = vector.broadcast %104 : vector<16x1xf32> to vector<16x16xf32>
    %106 = arith.subf %102, %105 : vector<16x16xf32>
    %107 = math.exp %106 : vector<16x16xf32>
    %cst_43 = arith.constant dense<0.000000e+00> : vector<16xf32>
    %108 = vector.multi_reduction <add>, %107, %cst_43 [1] : vector<16x16xf32> to vector<16xf32>
    %109 = vector.shape_cast %108 : vector<16xf32> to vector<16x1xf32>
    %110 = vector.broadcast %109 : vector<16x1xf32> to vector<16x16xf32>
    %111 = arith.divf %107, %110 : vector<16x16xf32>
    %cst_44 = arith.constant dense<0.000000e+00> : vector<16x8xf32>
    %112 = tpu.matmul %111, %98, %cst_44 {dimension_numbers = #tpu.dot_dimension_numbers<[1], [0], [0], [1], [0, 0, 1, 1], [], []>} : vector<16x16xf32>, vector<16x8xf32>, vector<16x8xf32> -> vector<16x8xf32>
    %113 = tpu.concatenate %61, %78, %95, %112 in 1 : vector<16x8xf32>, vector<16x8xf32>, vector<16x8xf32>, vector<16x8xf32> -> vector<16x32xf32>
    %c0_45 = arith.constant 0 : index
    %c0_46 = arith.constant 0 : index
    %c0_47 = arith.constant 0 : index
    %114 = vector.load %arg11[%c0_45, %c0_46, %c0_47] : memref<2x32x32xf32, #tpu.memory_space<vmem>>, vector<1x32x32xf32>
    %115 = vector.shape_cast %114 : vector<1x32x32xf32> to vector<32x32xf32>
    %cst_48 = arith.constant dense<0.000000e+00> : vector<16x32xf32>
    %116 = tpu.matmul %113, %115, %cst_48 {dimension_numbers = #tpu.dot_dimension_numbers<[1], [0], [0], [1], [0, 0, 1, 1], [], []>} : vector<16x32xf32>, vector<32x32xf32>, vector<16x32xf32> -> vector<16x32xf32>
    %c0_49 = arith.constant 0 : index
    %c0_50 = arith.constant 0 : index
    %c0_51 = arith.constant 0 : index
    %117 = vector.load %arg12[%c0_49, %c0_50, %c0_51] : memref<2x1x32xf32, #tpu.memory_space<vmem>>, vector<1x1x32xf32>
    %118 = vector.shape_cast %117 : vector<1x1x32xf32> to vector<1x32xf32>
    %119 = vector.broadcast %118 : vector<1x32xf32> to vector<16x32xf32>
    %120 = arith.addf %116, %119 : vector<16x32xf32>
    %121 = arith.addf %36, %120 : vector<16x32xf32>
    %c0_52 = arith.constant 0 : index
    %c0_53 = arith.constant 0 : index
    %c0_54 = arith.constant 0 : index
    %122 = vector.load %arg13[%c0_52, %c0_53, %c0_54] : memref<2x1x32xf32, #tpu.memory_space<vmem>>, vector<1x1x32xf32>
    %123 = vector.shape_cast %122 : vector<1x1x32xf32> to vector<1x32xf32>
    %c0_55 = arith.constant 0 : index
    %c0_56 = arith.constant 0 : index
    %c0_57 = arith.constant 0 : index
    %124 = vector.load %arg14[%c0_55, %c0_56, %c0_57] : memref<2x1x32xf32, #tpu.memory_space<vmem>>, vector<1x1x32xf32>
    %125 = vector.shape_cast %124 : vector<1x1x32xf32> to vector<1x32xf32>
    %cst_58 = arith.constant dense<0.000000e+00> : vector<16xf32>
    %126 = vector.multi_reduction <add>, %121, %cst_58 [1] : vector<16x32xf32> to vector<16xf32>
    %127 = vector.shape_cast %126 : vector<16xf32> to vector<16x1xf32>
    %cst_59 = arith.constant 3.200000e+01 : f32
    %128 = vector.broadcast %cst_59 : f32 to vector<16x1xf32>
    %129 = arith.divf %127, %128 : vector<16x1xf32>
    %130 = vector.broadcast %129 : vector<16x1xf32> to vector<16x32xf32>
    %131 = arith.subf %121, %130 : vector<16x32xf32>
    %132 = arith.mulf %131, %131 : vector<16x32xf32>
    %cst_60 = arith.constant dense<0.000000e+00> : vector<16xf32>
    %133 = vector.multi_reduction <add>, %132, %cst_60 [1] : vector<16x32xf32> to vector<16xf32>
    %134 = vector.shape_cast %133 : vector<16xf32> to vector<16x1xf32>
    %cst_61 = arith.constant 3.200000e+01 : f32
    %135 = vector.broadcast %cst_61 : f32 to vector<16x1xf32>
    %136 = arith.divf %134, %135 : vector<16x1xf32>
    %137 = vector.broadcast %129 : vector<16x1xf32> to vector<16x32xf32>
    %138 = arith.subf %121, %137 : vector<16x32xf32>
    %cst_62 = arith.constant 9.99999996E-13 : f32
    %139 = vector.broadcast %cst_62 : f32 to vector<16x1xf32>
    %140 = arith.addf %136, %139 : vector<16x1xf32>
    %141 = math.rsqrt %140 : vector<16x1xf32>
    %142 = vector.broadcast %141 : vector<16x1xf32> to vector<16x32xf32>
    %143 = arith.mulf %138, %142 : vector<16x32xf32>
    %144 = vector.broadcast %123 : vector<1x32xf32> to vector<16x32xf32>
    %145 = arith.mulf %143, %144 : vector<16x32xf32>
    %146 = vector.broadcast %125 : vector<1x32xf32> to vector<16x32xf32>
    %147 = arith.addf %145, %146 : vector<16x32xf32>
    %c0_63 = arith.constant 0 : index
    %c0_64 = arith.constant 0 : index
    %c0_65 = arith.constant 0 : index
    %148 = vector.load %arg15[%c0_63, %c0_64, %c0_65] : memref<2x32x64xf32, #tpu.memory_space<vmem>>, vector<1x32x64xf32>
    %149 = vector.shape_cast %148 : vector<1x32x64xf32> to vector<32x64xf32>
    %cst_66 = arith.constant dense<0.000000e+00> : vector<16x64xf32>
    %150 = tpu.matmul %147, %149, %cst_66 {dimension_numbers = #tpu.dot_dimension_numbers<[1], [0], [0], [1], [0, 0, 1, 1], [], []>} : vector<16x32xf32>, vector<32x64xf32>, vector<16x64xf32> -> vector<16x64xf32>
    %c0_67 = arith.constant 0 : index
    %c0_68 = arith.constant 0 : index
    %c0_69 = arith.constant 0 : index
    %151 = vector.load %arg16[%c0_67, %c0_68, %c0_69] : memref<2x1x64xf32, #tpu.memory_space<vmem>>, vector<1x1x64xf32>
    %152 = vector.shape_cast %151 : vector<1x1x64xf32> to vector<1x64xf32>
    %153 = vector.broadcast %152 : vector<1x64xf32> to vector<16x64xf32>
    %154 = arith.addf %150, %153 : vector<16x64xf32>
    %cst_70 = arith.constant 5.000000e-01 : f32
    %155 = vector.broadcast %cst_70 : f32 to vector<16x64xf32>
    %156 = arith.mulf %155, %154 : vector<16x64xf32>
    %cst_71 = arith.constant 0.707106769 : f32
    %157 = vector.broadcast %cst_71 : f32 to vector<16x64xf32>
    %158 = arith.mulf %154, %157 : vector<16x64xf32>
    %159 = math.erf %158 : vector<16x64xf32>
    %cst_72 = arith.constant 1.000000e+00 : f32
    %160 = vector.broadcast %cst_72 : f32 to vector<16x64xf32>
    %161 = arith.addf %160, %159 : vector<16x64xf32>
    %162 = arith.mulf %156, %161 : vector<16x64xf32>
    %c0_73 = arith.constant 0 : index
    %c0_74 = arith.constant 0 : index
    %c0_75 = arith.constant 0 : index
    %163 = vector.load %arg17[%c0_73, %c0_74, %c0_75] : memref<2x64x32xf32, #tpu.memory_space<vmem>>, vector<1x64x32xf32>
    %164 = vector.shape_cast %163 : vector<1x64x32xf32> to vector<64x32xf32>
    %cst_76 = arith.constant dense<0.000000e+00> : vector<16x32xf32>
    %165 = tpu.matmul %162, %164, %cst_76 {dimension_numbers = #tpu.dot_dimension_numbers<[1], [0], [0], [1], [0, 0, 1, 1], [], []>} : vector<16x64xf32>, vector<64x32xf32>, vector<16x32xf32> -> vector<16x32xf32>
    %c0_77 = arith.constant 0 : index
    %c0_78 = arith.constant 0 : index
    %c0_79 = arith.constant 0 : index
    %166 = vector.load %arg18[%c0_77, %c0_78, %c0_79] : memref<2x1x32xf32, #tpu.memory_space<vmem>>, vector<1x1x32xf32>
    %167 = vector.shape_cast %166 : vector<1x1x32xf32> to vector<1x32xf32>
    %168 = vector.broadcast %167 : vector<1x32xf32> to vector<16x32xf32>
    %169 = arith.addf %165, %168 : vector<16x32xf32>
    %170 = arith.addf %147, %169 : vector<16x32xf32>
    %c0_80 = arith.constant 0 : index
    %c0_81 = arith.constant 0 : index
    %c0_82 = arith.constant 0 : index
    %171 = vector.load %arg19[%c0_80, %c0_81, %c0_82] : memref<2x1x32xf32, #tpu.memory_space<vmem>>, vector<1x1x32xf32>
    %172 = vector.shape_cast %171 : vector<1x1x32xf32> to vector<1x32xf32>
    %c0_83 = arith.constant 0 : index
    %c0_84 = arith.constant 0 : index
    %c0_85 = arith.constant 0 : index
    %173 = vector.load %arg20[%c0_83, %c0_84, %c0_85] : memref<2x1x32xf32, #tpu.memory_space<vmem>>, vector<1x1x32xf32>
    %174 = vector.shape_cast %173 : vector<1x1x32xf32> to vector<1x32xf32>
    %cst_86 = arith.constant dense<0.000000e+00> : vector<16xf32>
    %175 = vector.multi_reduction <add>, %170, %cst_86 [1] : vector<16x32xf32> to vector<16xf32>
    %176 = vector.shape_cast %175 : vector<16xf32> to vector<16x1xf32>
    %cst_87 = arith.constant 3.200000e+01 : f32
    %177 = vector.broadcast %cst_87 : f32 to vector<16x1xf32>
    %178 = arith.divf %176, %177 : vector<16x1xf32>
    %179 = vector.broadcast %178 : vector<16x1xf32> to vector<16x32xf32>
    %180 = arith.subf %170, %179 : vector<16x32xf32>
    %181 = arith.mulf %180, %180 : vector<16x32xf32>
    %cst_88 = arith.constant dense<0.000000e+00> : vector<16xf32>
    %182 = vector.multi_reduction <add>, %181, %cst_88 [1] : vector<16x32xf32> to vector<16xf32>
    %183 = vector.shape_cast %182 : vector<16xf32> to vector<16x1xf32>
    %cst_89 = arith.constant 3.200000e+01 : f32
    %184 = vector.broadcast %cst_89 : f32 to vector<16x1xf32>
    %185 = arith.divf %183, %184 : vector<16x1xf32>
    %186 = vector.broadcast %178 : vector<16x1xf32> to vector<16x32xf32>
    %187 = arith.subf %170, %186 : vector<16x32xf32>
    %cst_90 = arith.constant 9.99999996E-13 : f32
    %188 = vector.broadcast %cst_90 : f32 to vector<16x1xf32>
    %189 = arith.addf %185, %188 : vector<16x1xf32>
    %190 = math.rsqrt %189 : vector<16x1xf32>
    %191 = vector.broadcast %190 : vector<16x1xf32> to vector<16x32xf32>
    %192 = arith.mulf %187, %191 : vector<16x32xf32>
    %193 = vector.broadcast %172 : vector<1x32xf32> to vector<16x32xf32>
    %194 = arith.mulf %192, %193 : vector<16x32xf32>
    %195 = vector.broadcast %174 : vector<1x32xf32> to vector<16x32xf32>
    %196 = arith.addf %194, %195 : vector<16x32xf32>
    %c1 = arith.constant 1 : index
    %c0_91 = arith.constant 0 : index
    %c0_92 = arith.constant 0 : index
    %197 = vector.load %arg9[%c1, %c0_91, %c0_92] : memref<2x32x96xf32, #tpu.memory_space<vmem>>, vector<1x32x96xf32>
    %198 = vector.shape_cast %197 : vector<1x32x96xf32> to vector<32x96xf32>
    %cst_93 = arith.constant dense<0.000000e+00> : vector<16x96xf32>
    %199 = tpu.matmul %196, %198, %cst_93 {dimension_numbers = #tpu.dot_dimension_numbers<[1], [0], [0], [1], [0, 0, 1, 1], [], []>} : vector<16x32xf32>, vector<32x96xf32>, vector<16x96xf32> -> vector<16x96xf32>
    %c1_94 = arith.constant 1 : index
    %c0_95 = arith.constant 0 : index
    %c0_96 = arith.constant 0 : index
    %200 = vector.load %arg10[%c1_94, %c0_95, %c0_96] : memref<2x1x96xf32, #tpu.memory_space<vmem>>, vector<1x1x96xf32>
    %201 = vector.shape_cast %200 : vector<1x1x96xf32> to vector<1x96xf32>
    %202 = vector.broadcast %201 : vector<1x96xf32> to vector<16x96xf32>
    %203 = arith.addf %199, %202 : vector<16x96xf32>
    %204 = vector.extract_strided_slice %203 {offsets = [0, 0], sizes = [16, 8], strides = [1, 1]} : vector<16x96xf32> to vector<16x8xf32>
    %205 = vector.extract_strided_slice %203 {offsets = [0, 32], sizes = [16, 8], strides = [1, 1]} : vector<16x96xf32> to vector<16x8xf32>
    %206 = vector.extract_strided_slice %203 {offsets = [0, 64], sizes = [16, 8], strides = [1, 1]} : vector<16x96xf32> to vector<16x8xf32>
    %cst_97 = arith.constant dense<0.000000e+00> : vector<16x16xf32>
    %207 = tpu.matmul %204, %205, %cst_97 {dimension_numbers = #tpu.dot_dimension_numbers<[1], [1], [0], [0], [0, 0, 1, 0], [], []>} : vector<16x8xf32>, vector<16x8xf32>, vector<16x16xf32> -> vector<16x16xf32>
    %cst_98 = arith.constant 0.353553385 : f32
    %208 = vector.broadcast %cst_98 : f32 to vector<16x16xf32>
    %209 = arith.mulf %207, %208 : vector<16x16xf32>
    %210 = arith.addf %209, %37 : vector<16x16xf32>
    %cst_99 = arith.constant dense<0xFF800000> : vector<16xf32>
    %211 = vector.multi_reduction <maximumf>, %210, %cst_99 [1] : vector<16x16xf32> to vector<16xf32>
    %212 = vector.shape_cast %211 : vector<16xf32> to vector<16x1xf32>
    %213 = vector.broadcast %212 : vector<16x1xf32> to vector<16x16xf32>
    %214 = arith.subf %210, %213 : vector<16x16xf32>
    %215 = math.exp %214 : vector<16x16xf32>
    %cst_100 = arith.constant dense<0.000000e+00> : vector<16xf32>
    %216 = vector.multi_reduction <add>, %215, %cst_100 [1] : vector<16x16xf32> to vector<16xf32>
    %217 = vector.shape_cast %216 : vector<16xf32> to vector<16x1xf32>
    %218 = vector.broadcast %217 : vector<16x1xf32> to vector<16x16xf32>
    %219 = arith.divf %215, %218 : vector<16x16xf32>
    %cst_101 = arith.constant dense<0.000000e+00> : vector<16x8xf32>
    %220 = tpu.matmul %219, %206, %cst_101 {dimension_numbers = #tpu.dot_dimension_numbers<[1], [0], [0], [1], [0, 0, 1, 1], [], []>} : vector<16x16xf32>, vector<16x8xf32>, vector<16x8xf32> -> vector<16x8xf32>
    %221 = vector.extract_strided_slice %203 {offsets = [0, 8], sizes = [16, 8], strides = [1, 1]} : vector<16x96xf32> to vector<16x8xf32>
    %222 = vector.extract_strided_slice %203 {offsets = [0, 40], sizes = [16, 8], strides = [1, 1]} : vector<16x96xf32> to vector<16x8xf32>
    %223 = vector.extract_strided_slice %203 {offsets = [0, 72], sizes = [16, 8], strides = [1, 1]} : vector<16x96xf32> to vector<16x8xf32>
    %cst_102 = arith.constant dense<0.000000e+00> : vector<16x16xf32>
    %224 = tpu.matmul %221, %222, %cst_102 {dimension_numbers = #tpu.dot_dimension_numbers<[1], [1], [0], [0], [0, 0, 1, 0], [], []>} : vector<16x8xf32>, vector<16x8xf32>, vector<16x16xf32> -> vector<16x16xf32>
    %cst_103 = arith.constant 0.353553385 : f32
    %225 = vector.broadcast %cst_103 : f32 to vector<16x16xf32>
    %226 = arith.mulf %224, %225 : vector<16x16xf32>
    %227 = arith.addf %226, %37 : vector<16x16xf32>
    %cst_104 = arith.constant dense<0xFF800000> : vector<16xf32>
    %228 = vector.multi_reduction <maximumf>, %227, %cst_104 [1] : vector<16x16xf32> to vector<16xf32>
    %229 = vector.shape_cast %228 : vector<16xf32> to vector<16x1xf32>
    %230 = vector.broadcast %229 : vector<16x1xf32> to vector<16x16xf32>
    %231 = arith.subf %227, %230 : vector<16x16xf32>
    %232 = math.exp %231 : vector<16x16xf32>
    %cst_105 = arith.constant dense<0.000000e+00> : vector<16xf32>
    %233 = vector.multi_reduction <add>, %232, %cst_105 [1] : vector<16x16xf32> to vector<16xf32>
    %234 = vector.shape_cast %233 : vector<16xf32> to vector<16x1xf32>
    %235 = vector.broadcast %234 : vector<16x1xf32> to vector<16x16xf32>
    %236 = arith.divf %232, %235 : vector<16x16xf32>
    %cst_106 = arith.constant dense<0.000000e+00> : vector<16x8xf32>
    %237 = tpu.matmul %236, %223, %cst_106 {dimension_numbers = #tpu.dot_dimension_numbers<[1], [0], [0], [1], [0, 0, 1, 1], [], []>} : vector<16x16xf32>, vector<16x8xf32>, vector<16x8xf32> -> vector<16x8xf32>
    %238 = vector.extract_strided_slice %203 {offsets = [0, 16], sizes = [16, 8], strides = [1, 1]} : vector<16x96xf32> to vector<16x8xf32>
    %239 = vector.extract_strided_slice %203 {offsets = [0, 48], sizes = [16, 8], strides = [1, 1]} : vector<16x96xf32> to vector<16x8xf32>
    %240 = vector.extract_strided_slice %203 {offsets = [0, 80], sizes = [16, 8], strides = [1, 1]} : vector<16x96xf32> to vector<16x8xf32>
    %cst_107 = arith.constant dense<0.000000e+00> : vector<16x16xf32>
    %241 = tpu.matmul %238, %239, %cst_107 {dimension_numbers = #tpu.dot_dimension_numbers<[1], [1], [0], [0], [0, 0, 1, 0], [], []>} : vector<16x8xf32>, vector<16x8xf32>, vector<16x16xf32> -> vector<16x16xf32>
    %cst_108 = arith.constant 0.353553385 : f32
    %242 = vector.broadcast %cst_108 : f32 to vector<16x16xf32>
    %243 = arith.mulf %241, %242 : vector<16x16xf32>
    %244 = arith.addf %243, %37 : vector<16x16xf32>
    %cst_109 = arith.constant dense<0xFF800000> : vector<16xf32>
    %245 = vector.multi_reduction <maximumf>, %244, %cst_109 [1] : vector<16x16xf32> to vector<16xf32>
    %246 = vector.shape_cast %245 : vector<16xf32> to vector<16x1xf32>
    %247 = vector.broadcast %246 : vector<16x1xf32> to vector<16x16xf32>
    %248 = arith.subf %244, %247 : vector<16x16xf32>
    %249 = math.exp %248 : vector<16x16xf32>
    %cst_110 = arith.constant dense<0.000000e+00> : vector<16xf32>
    %250 = vector.multi_reduction <add>, %249, %cst_110 [1] : vector<16x16xf32> to vector<16xf32>
    %251 = vector.shape_cast %250 : vector<16xf32> to vector<16x1xf32>
    %252 = vector.broadcast %251 : vector<16x1xf32> to vector<16x16xf32>
    %253 = arith.divf %249, %252 : vector<16x16xf32>
    %cst_111 = arith.constant dense<0.000000e+00> : vector<16x8xf32>
    %254 = tpu.matmul %253, %240, %cst_111 {dimension_numbers = #tpu.dot_dimension_numbers<[1], [0], [0], [1], [0, 0, 1, 1], [], []>} : vector<16x16xf32>, vector<16x8xf32>, vector<16x8xf32> -> vector<16x8xf32>
    %255 = vector.extract_strided_slice %203 {offsets = [0, 24], sizes = [16, 8], strides = [1, 1]} : vector<16x96xf32> to vector<16x8xf32>
    %256 = vector.extract_strided_slice %203 {offsets = [0, 56], sizes = [16, 8], strides = [1, 1]} : vector<16x96xf32> to vector<16x8xf32>
    %257 = vector.extract_strided_slice %203 {offsets = [0, 88], sizes = [16, 8], strides = [1, 1]} : vector<16x96xf32> to vector<16x8xf32>
    %cst_112 = arith.constant dense<0.000000e+00> : vector<16x16xf32>
    %258 = tpu.matmul %255, %256, %cst_112 {dimension_numbers = #tpu.dot_dimension_numbers<[1], [1], [0], [0], [0, 0, 1, 0], [], []>} : vector<16x8xf32>, vector<16x8xf32>, vector<16x16xf32> -> vector<16x16xf32>
    %cst_113 = arith.constant 0.353553385 : f32
    %259 = vector.broadcast %cst_113 : f32 to vector<16x16xf32>
    %260 = arith.mulf %258, %259 : vector<16x16xf32>
    %261 = arith.addf %260, %37 : vector<16x16xf32>
    %cst_114 = arith.constant dense<0xFF800000> : vector<16xf32>
    %262 = vector.multi_reduction <maximumf>, %261, %cst_114 [1] : vector<16x16xf32> to vector<16xf32>
    %263 = vector.shape_cast %262 : vector<16xf32> to vector<16x1xf32>
    %264 = vector.broadcast %263 : vector<16x1xf32> to vector<16x16xf32>
    %265 = arith.subf %261, %264 : vector<16x16xf32>
    %266 = math.exp %265 : vector<16x16xf32>
    %cst_115 = arith.constant dense<0.000000e+00> : vector<16xf32>
    %267 = vector.multi_reduction <add>, %266, %cst_115 [1] : vector<16x16xf32> to vector<16xf32>
    %268 = vector.shape_cast %267 : vector<16xf32> to vector<16x1xf32>
    %269 = vector.broadcast %268 : vector<16x1xf32> to vector<16x16xf32>
    %270 = arith.divf %266, %269 : vector<16x16xf32>
    %cst_116 = arith.constant dense<0.000000e+00> : vector<16x8xf32>
    %271 = tpu.matmul %270, %257, %cst_116 {dimension_numbers = #tpu.dot_dimension_numbers<[1], [0], [0], [1], [0, 0, 1, 1], [], []>} : vector<16x16xf32>, vector<16x8xf32>, vector<16x8xf32> -> vector<16x8xf32>
    %272 = tpu.concatenate %220, %237, %254, %271 in 1 : vector<16x8xf32>, vector<16x8xf32>, vector<16x8xf32>, vector<16x8xf32> -> vector<16x32xf32>
    %c1_117 = arith.constant 1 : index
    %c0_118 = arith.constant 0 : index
    %c0_119 = arith.constant 0 : index
    %273 = vector.load %arg11[%c1_117, %c0_118, %c0_119] : memref<2x32x32xf32, #tpu.memory_space<vmem>>, vector<1x32x32xf32>
    %274 = vector.shape_cast %273 : vector<1x32x32xf32> to vector<32x32xf32>
    %cst_120 = arith.constant dense<0.000000e+00> : vector<16x32xf32>
    %275 = tpu.matmul %272, %274, %cst_120 {dimension_numbers = #tpu.dot_dimension_numbers<[1], [0], [0], [1], [0, 0, 1, 1], [], []>} : vector<16x32xf32>, vector<32x32xf32>, vector<16x32xf32> -> vector<16x32xf32>
    %c1_121 = arith.constant 1 : index
    %c0_122 = arith.constant 0 : index
    %c0_123 = arith.constant 0 : index
    %276 = vector.load %arg12[%c1_121, %c0_122, %c0_123] : memref<2x1x32xf32, #tpu.memory_space<vmem>>, vector<1x1x32xf32>
    %277 = vector.shape_cast %276 : vector<1x1x32xf32> to vector<1x32xf32>
    %278 = vector.broadcast %277 : vector<1x32xf32> to vector<16x32xf32>
    %279 = arith.addf %275, %278 : vector<16x32xf32>
    %280 = arith.addf %196, %279 : vector<16x32xf32>
    %c1_124 = arith.constant 1 : index
    %c0_125 = arith.constant 0 : index
    %c0_126 = arith.constant 0 : index
    %281 = vector.load %arg13[%c1_124, %c0_125, %c0_126] : memref<2x1x32xf32, #tpu.memory_space<vmem>>, vector<1x1x32xf32>
    %282 = vector.shape_cast %281 : vector<1x1x32xf32> to vector<1x32xf32>
    %c1_127 = arith.constant 1 : index
    %c0_128 = arith.constant 0 : index
    %c0_129 = arith.constant 0 : index
    %283 = vector.load %arg14[%c1_127, %c0_128, %c0_129] : memref<2x1x32xf32, #tpu.memory_space<vmem>>, vector<1x1x32xf32>
    %284 = vector.shape_cast %283 : vector<1x1x32xf32> to vector<1x32xf32>
    %cst_130 = arith.constant dense<0.000000e+00> : vector<16xf32>
    %285 = vector.multi_reduction <add>, %280, %cst_130 [1] : vector<16x32xf32> to vector<16xf32>
    %286 = vector.shape_cast %285 : vector<16xf32> to vector<16x1xf32>
    %cst_131 = arith.constant 3.200000e+01 : f32
    %287 = vector.broadcast %cst_131 : f32 to vector<16x1xf32>
    %288 = arith.divf %286, %287 : vector<16x1xf32>
    %289 = vector.broadcast %288 : vector<16x1xf32> to vector<16x32xf32>
    %290 = arith.subf %280, %289 : vector<16x32xf32>
    %291 = arith.mulf %290, %290 : vector<16x32xf32>
    %cst_132 = arith.constant dense<0.000000e+00> : vector<16xf32>
    %292 = vector.multi_reduction <add>, %291, %cst_132 [1] : vector<16x32xf32> to vector<16xf32>
    %293 = vector.shape_cast %292 : vector<16xf32> to vector<16x1xf32>
    %cst_133 = arith.constant 3.200000e+01 : f32
    %294 = vector.broadcast %cst_133 : f32 to vector<16x1xf32>
    %295 = arith.divf %293, %294 : vector<16x1xf32>
    %296 = vector.broadcast %288 : vector<16x1xf32> to vector<16x32xf32>
    %297 = arith.subf %280, %296 : vector<16x32xf32>
    %cst_134 = arith.constant 9.99999996E-13 : f32
    %298 = vector.broadcast %cst_134 : f32 to vector<16x1xf32>
    %299 = arith.addf %295, %298 : vector<16x1xf32>
    %300 = math.rsqrt %299 : vector<16x1xf32>
    %301 = vector.broadcast %300 : vector<16x1xf32> to vector<16x32xf32>
    %302 = arith.mulf %297, %301 : vector<16x32xf32>
    %303 = vector.broadcast %282 : vector<1x32xf32> to vector<16x32xf32>
    %304 = arith.mulf %302, %303 : vector<16x32xf32>
    %305 = vector.broadcast %284 : vector<1x32xf32> to vector<16x32xf32>
    %306 = arith.addf %304, %305 : vector<16x32xf32>
    %c1_135 = arith.constant 1 : index
    %c0_136 = arith.constant 0 : index
    %c0_137 = arith.constant 0 : index
    %307 = vector.load %arg15[%c1_135, %c0_136, %c0_137] : memref<2x32x64xf32, #tpu.memory_space<vmem>>, vector<1x32x64xf32>
    %308 = vector.shape_cast %307 : vector<1x32x64xf32> to vector<32x64xf32>
    %cst_138 = arith.constant dense<0.000000e+00> : vector<16x64xf32>
    %309 = tpu.matmul %306, %308, %cst_138 {dimension_numbers = #tpu.dot_dimension_numbers<[1], [0], [0], [1], [0, 0, 1, 1], [], []>} : vector<16x32xf32>, vector<32x64xf32>, vector<16x64xf32> -> vector<16x64xf32>
    %c1_139 = arith.constant 1 : index
    %c0_140 = arith.constant 0 : index
    %c0_141 = arith.constant 0 : index
    %310 = vector.load %arg16[%c1_139, %c0_140, %c0_141] : memref<2x1x64xf32, #tpu.memory_space<vmem>>, vector<1x1x64xf32>
    %311 = vector.shape_cast %310 : vector<1x1x64xf32> to vector<1x64xf32>
    %312 = vector.broadcast %311 : vector<1x64xf32> to vector<16x64xf32>
    %313 = arith.addf %309, %312 : vector<16x64xf32>
    %cst_142 = arith.constant 5.000000e-01 : f32
    %314 = vector.broadcast %cst_142 : f32 to vector<16x64xf32>
    %315 = arith.mulf %314, %313 : vector<16x64xf32>
    %cst_143 = arith.constant 0.707106769 : f32
    %316 = vector.broadcast %cst_143 : f32 to vector<16x64xf32>
    %317 = arith.mulf %313, %316 : vector<16x64xf32>
    %318 = math.erf %317 : vector<16x64xf32>
    %cst_144 = arith.constant 1.000000e+00 : f32
    %319 = vector.broadcast %cst_144 : f32 to vector<16x64xf32>
    %320 = arith.addf %319, %318 : vector<16x64xf32>
    %321 = arith.mulf %315, %320 : vector<16x64xf32>
    %c1_145 = arith.constant 1 : index
    %c0_146 = arith.constant 0 : index
    %c0_147 = arith.constant 0 : index
    %322 = vector.load %arg17[%c1_145, %c0_146, %c0_147] : memref<2x64x32xf32, #tpu.memory_space<vmem>>, vector<1x64x32xf32>
    %323 = vector.shape_cast %322 : vector<1x64x32xf32> to vector<64x32xf32>
    %cst_148 = arith.constant dense<0.000000e+00> : vector<16x32xf32>
    %324 = tpu.matmul %321, %323, %cst_148 {dimension_numbers = #tpu.dot_dimension_numbers<[1], [0], [0], [1], [0, 0, 1, 1], [], []>} : vector<16x64xf32>, vector<64x32xf32>, vector<16x32xf32> -> vector<16x32xf32>
    %c1_149 = arith.constant 1 : index
    %c0_150 = arith.constant 0 : index
    %c0_151 = arith.constant 0 : index
    %325 = vector.load %arg18[%c1_149, %c0_150, %c0_151] : memref<2x1x32xf32, #tpu.memory_space<vmem>>, vector<1x1x32xf32>
    %326 = vector.shape_cast %325 : vector<1x1x32xf32> to vector<1x32xf32>
    %327 = vector.broadcast %326 : vector<1x32xf32> to vector<16x32xf32>
    %328 = arith.addf %324, %327 : vector<16x32xf32>
    %329 = arith.addf %306, %328 : vector<16x32xf32>
    %c1_152 = arith.constant 1 : index
    %c0_153 = arith.constant 0 : index
    %c0_154 = arith.constant 0 : index
    %330 = vector.load %arg19[%c1_152, %c0_153, %c0_154] : memref<2x1x32xf32, #tpu.memory_space<vmem>>, vector<1x1x32xf32>
    %331 = vector.shape_cast %330 : vector<1x1x32xf32> to vector<1x32xf32>
    %c1_155 = arith.constant 1 : index
    %c0_156 = arith.constant 0 : index
    %c0_157 = arith.constant 0 : index
    %332 = vector.load %arg20[%c1_155, %c0_156, %c0_157] : memref<2x1x32xf32, #tpu.memory_space<vmem>>, vector<1x1x32xf32>
    %333 = vector.shape_cast %332 : vector<1x1x32xf32> to vector<1x32xf32>
    %cst_158 = arith.constant dense<0.000000e+00> : vector<16xf32>
    %334 = vector.multi_reduction <add>, %329, %cst_158 [1] : vector<16x32xf32> to vector<16xf32>
    %335 = vector.shape_cast %334 : vector<16xf32> to vector<16x1xf32>
    %cst_159 = arith.constant 3.200000e+01 : f32
    %336 = vector.broadcast %cst_159 : f32 to vector<16x1xf32>
    %337 = arith.divf %335, %336 : vector<16x1xf32>
    %338 = vector.broadcast %337 : vector<16x1xf32> to vector<16x32xf32>
    %339 = arith.subf %329, %338 : vector<16x32xf32>
    %340 = arith.mulf %339, %339 : vector<16x32xf32>
    %cst_160 = arith.constant dense<0.000000e+00> : vector<16xf32>
    %341 = vector.multi_reduction <add>, %340, %cst_160 [1] : vector<16x32xf32> to vector<16xf32>
    %342 = vector.shape_cast %341 : vector<16xf32> to vector<16x1xf32>
    %cst_161 = arith.constant 3.200000e+01 : f32
    %343 = vector.broadcast %cst_161 : f32 to vector<16x1xf32>
    %344 = arith.divf %342, %343 : vector<16x1xf32>
    %345 = vector.broadcast %337 : vector<16x1xf32> to vector<16x32xf32>
    %346 = arith.subf %329, %345 : vector<16x32xf32>
    %cst_162 = arith.constant 9.99999996E-13 : f32
    %347 = vector.broadcast %cst_162 : f32 to vector<16x1xf32>
    %348 = arith.addf %344, %347 : vector<16x1xf32>
    %349 = math.rsqrt %348 : vector<16x1xf32>
    %350 = vector.broadcast %349 : vector<16x1xf32> to vector<16x32xf32>
    %351 = arith.mulf %346, %350 : vector<16x32xf32>
    %352 = vector.broadcast %331 : vector<1x32xf32> to vector<16x32xf32>
    %353 = arith.mulf %351, %352 : vector<16x32xf32>
    %354 = vector.broadcast %333 : vector<1x32xf32> to vector<16x32xf32>
    %355 = arith.addf %353, %354 : vector<16x32xf32>
    %c0_163 = arith.constant 0 : index
    %c0_164 = arith.constant 0 : index
    %356 = vector.load %arg21[%c0_163, %c0_164] : memref<32x128xf32, #tpu.memory_space<vmem>>, vector<32x128xf32>
    %cst_165 = arith.constant dense<0.000000e+00> : vector<16x128xf32>
    %357 = tpu.matmul %355, %356, %cst_165 {dimension_numbers = #tpu.dot_dimension_numbers<[1], [0], [0], [1], [0, 0, 1, 1], [], []>} : vector<16x32xf32>, vector<32x128xf32>, vector<16x128xf32> -> vector<16x128xf32>
    %c0_166 = arith.constant 0 : index
    %c0_167 = arith.constant 0 : index
    %358 = vector.load %arg22[%c0_166, %c0_167] : memref<1x128xf32, #tpu.memory_space<vmem>>, vector<1x128xf32>
    %359 = vector.broadcast %358 : vector<1x128xf32> to vector<16x128xf32>
    %360 = arith.addf %357, %359 : vector<16x128xf32>
    %c0_168 = arith.constant 0 : index
    %c0_169 = arith.constant 0 : index
    %361 = vector.load %arg23[%c0_168, %c0_169] : memref<16x128xf32, #tpu.memory_space<vmem>>, vector<16x128xf32>
    tpu.vector_store %arg23[%c0_168, %c0_169], %360 {strides = array<i32>} : memref<16x128xf32, #tpu.memory_space<vmem>>, vector<16x128xf32>,
    %c0_170 = arith.constant 0 : index
    %c0_171 = arith.constant 0 : index
    %362 = vector.load %arg3[%c0_170, %c0_171] : memref<16x1xi32, #tpu.memory_space<vmem>>, vector<16x1xi32>
    %c-100_i32 = arith.constant -100 : i32
    %363 = vector.broadcast %c-100_i32 : i32 to vector<16x1xi32>
    %364 = arith.cmpi ne, %362, %363 : vector<16x1xi32>
    %c0_i32 = arith.constant 0 : i32
    %365 = vector.broadcast %c0_i32 : i32 to vector<16x1xi32>
    %366 = arith.select %364, %362, %365 : vector<16x1xi1>, vector<16x1xi32>
    %cst_172 = arith.constant dense<0xFF800000> : vector<16xf32>
    %367 = vector.multi_reduction <maximumf>, %360, %cst_172 [1] : vector<16x128xf32> to vector<16xf32>
    %368 = vector.shape_cast %367 : vector<16xf32> to vector<16x1xf32>
    %369 = vector.broadcast %368 : vector<16x1xf32> to vector<16x128xf32>
    %370 = arith.subf %360, %369 : vector<16x128xf32>
    %371 = math.exp %370 : vector<16x128xf32>
    %cst_173 = arith.constant dense<0.000000e+00> : vector<16xf32>
    %372 = vector.multi_reduction <add>, %371, %cst_173 [1] : vector<16x128xf32> to vector<16xf32>
    %373 = vector.shape_cast %372 : vector<16xf32> to vector<16x1xf32>
    %374 = math.log %373 : vector<16x1xf32>
    %375 = arith.addf %374, %368 : vector<16x1xf32>
    %376 = tpu.iota {dimensions = array<i32: 1>} : vector<16x128xi32>
    %377 = vector.broadcast %366 : vector<16x1xi32> to vector<16x128xi32>
    %378 = arith.cmpi eq, %377, %376 : vector<16x128xi32>
    %379 = arith.extui %378 : vector<16x128xi1> to vector<16x128xi32>
    %380 = arith.sitofp %379 : vector<16x128xi32> to vector<16x128xf32>
    %381 = arith.mulf %360, %380 : vector<16x128xf32>
    %cst_174 = arith.constant dense<0.000000e+00> : vector<16xf32>
    %382 = vector.multi_reduction <add>, %381, %cst_174 [1] : vector<16x128xf32> to vector<16xf32>
    %383 = vector.shape_cast %382 : vector<16xf32> to vector<16x1xf32>
    %384 = arith.extui %364 : vector<16x1xi1> to vector<16x1xi32>
    %385 = arith.sitofp %384 : vector<16x1xi32> to vector<16x1xf32>
    %386 = arith.subf %375, %383 : vector<16x1xf32>
    %387 = arith.mulf %386, %385 : vector<16x1xf32>
    %388 = vector.shape_cast %387 : vector<16x1xf32> to vector<1x16x1xf32>
    %cst_175 = arith.constant dense<0.000000e+00> : vector<1xf32>
    %389 = vector.multi_reduction <add>, %388, %cst_175 [1, 2] : vector<1x16x1xf32> to vector<1xf32>
    %390 = vector.shape_cast %389 : vector<1xf32> to vector<1x1x1xf32>
    %391 = vector.extract %390[0, 0, 0] : f32 from vector<1x1x1xf32>
    %392 = vector.shape_cast %385 : vector<16x1xf32> to vector<1x16x1xf32>
    %cst_176 = arith.constant dense<0.000000e+00> : vector<1xf32>
    %393 = vector.multi_reduction <add>, %392, %cst_176 [1, 2] : vector<1x16x1xf32> to vector<1xf32>
    %394 = vector.shape_cast %393 : vector<1xf32> to vector<1x1x1xf32>
    %395 = vector.extract %394[0, 0, 0] : f32 from vector<1x1x1xf32>
    %396 = tpu.iota {dimensions = array<i32: 1>} : vector<1x128xi32>
    %c0_i32_177 = arith.constant 0 : i32
    %397 = vector.broadcast %c0_i32_177 : i32 to vector<1x128xi32>
    %398 = arith.cmpi eq, %396, %397 : vector<1x128xi32>
    %c1_i32 = arith.constant 1 : i32
    %399 = vector.broadcast %c1_i32 : i32 to vector<1x128xi32>
    %400 = arith.cmpi eq, %396, %399 : vector<1x128xi32>
    %cst_178 = arith.constant 0.000000e+00 : f32
    %401 = vector.broadcast %395 : f32 to vector<1x128xf32>
    %402 = vector.broadcast %cst_178 : f32 to vector<1x128xf32>
    %403 = arith.select %400, %401, %402 : vector<1x128xi1>, vector<1x128xf32>
    %404 = vector.broadcast %391 : f32 to vector<1x128xf32>
    %405 = arith.select %398, %404, %403 : vector<1x128xi1>, vector<1x128xf32>
    %c0_179 = arith.constant 0 : index
    %c0_180 = arith.constant 0 : index
    %406 = vector.load %arg24[%c0_179, %c0_180] : memref<1x128xf32, #tpu.memory_space<vmem>>, vector<1x128xf32>
    tpu.vector_store %arg24[%c0_179, %c0_180], %405 {strides = array<i32>} : memref<1x128xf32, #tpu.memory_space<vmem>>, vector<1x128xf32>,
    return
  }
  func.func @transform_0(%arg0: i32) -> (i32, i32) {
    %c0_i32 = arith.constant 0 : i32
    %c0_i32_0 = arith.constant 0 : i32
    %c0_i32_1 = arith.constant 0 : i32
    return %c0_i32, %c0_i32_0 : i32, i32
  }
  func.func @transform_1(%arg0: i32) -> (i32, i32) {
    %c0_i32 = arith.constant 0 : i32
    %c0_i32_0 = arith.constant 0 : i32
    %c0_i32_1 = arith.constant 0 : i32
    return %c0_i32, %c0_i32_0 : i32, i32
  }
  func.func @transform_2(%arg0: i32) -> (i32, i32) {
    %c0_i32 = arith.constant 0 : i32
    %c0_i32_0 = arith.constant 0 : i32
    %c0_i32_1 = arith.constant 0 : i32
    return %c0_i32, %c0_i32_0 : i32, i32
  }
  func.func @transform_3(%arg0: i32) -> (i32, i32) {
    %c0_i32 = arith.constant 0 : i32
    %c0_i32_0 = arith.constant 0 : i32
    %c0_i32_1 = arith.constant 0 : i32
    return %c0_i32, %c0_i32_0 : i32, i32
  }
  func.func @transform_4(%arg0: i32) -> (i32, i32) {
    %c0_i32 = arith.constant 0 : i32
    %c0_i32_0 = arith.constant 0 : i32
    %c0_i32_1 = arith.constant 0 : i32
    return %c0_i32, %c0_i32_0 : i32, i32
  }
  func.func @transform_5(%arg0: i32) -> (i32, i32) {
    %c0_i32 = arith.constant 0 : i32
    %c0_i32_0 = arith.constant 0 : i32
    %c0_i32_1 = arith.constant 0 : i32
    return %c0_i32, %c0_i32_0 : i32, i32
  }
  func.func @transform_6(%arg0: i32) -> (i32, i32) {
    %c0_i32 = arith.constant 0 : i32
    %c0_i32_0 = arith.constant 0 : i32
    %c0_i32_1 = arith.constant 0 : i32
    return %c0_i32, %c0_i32_0 : i32, i32
  }
  func.func @transform_7(%arg0: i32) -> (i32, i32) {
    %c0_i32 = arith.constant 0 : i32
    %c0_i32_0 = arith.constant 0 : i32
    %c0_i32_1 = arith.constant 0 : i32
    return %c0_i32, %c0_i32_0 : i32, i32
  }
  func.func @transform_8(%arg0: i32) -> (i32, i32, i32) {
    %c0_i32 = arith.constant 0 : i32
    %c0_i32_0 = arith.constant 0 : i32
    %c0_i32_1 = arith.constant 0 : i32
    %c0_i32_2 = arith.constant 0 : i32
    return %c0_i32, %c0_i32_0, %c0_i32_1 : i32, i32, i32
  }
  func.func @transform_9(%arg0: i32) -> (i32, i32, i32) {
    %c0_i32 = arith.constant 0 : i32
    %c0_i32_0 = arith.constant 0 : i32
    %c0_i32_1 = arith.constant 0 : i32
    %c0_i32_2 = arith.constant 0 : i32
    return %c0_i32, %c0_i32_0, %c0_i32_1 : i32, i32, i32
  }
  func.func @transform_10(%arg0: i32) -> (i32, i32, i32) {
    %c0_i32 = arith.constant 0 : i32
    %c0_i32_0 = arith.constant 0 : i32
    %c0_i32_1 = arith.constant 0 : i32
    %c0_i32_2 = arith.constant 0 : i32
    return %c0_i32, %c0_i32_0, %c0_i32_1 : i32, i32, i32
  }
  func.func @transform_11(%arg0: i32) -> (i32, i32, i32) {
    %c0_i32 = arith.constant 0 : i32
    %c0_i32_0 = arith.constant 0 : i32
    %c0_i32_1 = arith.constant 0 : i32
    %c0_i32_2 = arith.constant 0 : i32
    return %c0_i32, %c0_i32_0, %c0_i32_1 : i32, i32, i32
  }
  func.func @transform_12(%arg0: i32) -> (i32, i32, i32) {
    %c0_i32 = arith.constant 0 : i32
    %c0_i32_0 = arith.constant 0 : i32
    %c0_i32_1 = arith.constant 0 : i32
    %c0_i32_2 = arith.constant 0 : i32
    return %c0_i32, %c0_i32_0, %c0_i32_1 : i32, i32, i32
  }
  func.func @transform_13(%arg0: i32) -> (i32, i32, i32) {
    %c0_i32 = arith.constant 0 : i32
    %c0_i32_0 = arith.constant 0 : i32
    %c0_i32_1 = arith.constant 0 : i32
    %c0_i32_2 = arith.constant 0 : i32
    return %c0_i32, %c0_i32_0, %c0_i32_1 : i32, i32, i32
  }
  func.func @transform_14(%arg0: i32) -> (i32, i32, i32) {
    %c0_i32 = arith.constant 0 : i32
    %c0_i32_0 = arith.constant 0 : i32
    %c0_i32_1 = arith.constant 0 : i32
    %c0_i32_2 = arith.constant 0 : i32
    return %c0_i32, %c0_i32_0, %c0_i32_1 : i32, i32, i32
  }
  func.func @transform_15(%arg0: i32) -> (i32, i32, i32) {
    %c0_i32 = arith.constant 0 : i32
    %c0_i32_0 = arith.constant 0 : i32
    %c0_i32_1 = arith.constant 0 : i32
    %c0_i32_2 = arith.constant 0 : i32
    return %c0_i32, %c0_i32_0, %c0_i32_1 : i32, i32, i32
  }
  func.func @transform_16(%arg0: i32) -> (i32, i32, i32) {
    %c0_i32 = arith.constant 0 : i32
    %c0_i32_0 = arith.constant 0 : i32
    %c0_i32_1 = arith.constant 0 : i32
    %c0_i32_2 = arith.constant 0 : i32
    return %c0_i32, %c0_i32_0, %c0_i32_1 : i32, i32, i32
  }
  func.func @transform_17(%arg0: i32) -> (i32, i32, i32) {
    %c0_i32 = arith.constant 0 : i32
    %c0_i32_0 = arith.constant 0 : i32
    %c0_i32_1 = arith.constant 0 : i32
    %c0_i32_2 = arith.constant 0 : i32
    return %c0_i32, %c0_i32_0, %c0_i32_1 : i32, i32, i32
  }
  func.func @transform_18(%arg0: i32) -> (i32, i32, i32) {
    %c0_i32 = arith.constant 0 : i32
    %c0_i32_0 = arith.constant 0 : i32
    %c0_i32_1 = arith.constant 0 : i32
    %c0_i32_2 = arith.constant 0 : i32
    return %c0_i32, %c0_i32_0, %c0_i32_1 : i32, i32, i32
  }
  func.func @transform_19(%arg0: i32) -> (i32, i32, i32) {
    %c0_i32 = arith.constant 0 : i32
    %c0_i32_0 = arith.constant 0 : i32
    %c0_i32_1 = arith.constant 0 : i32
    %c0_i32_2 = arith.constant 0 : i32
    return %c0_i32, %c0_i32_0, %c0_i32_1 : i32, i32, i32
  }
  func.func @transform_20(%arg0: i32) -> (i32, i32) {
    %c0_i32 = arith.constant 0 : i32
    %c0_i32_0 = arith.constant 0 : i32
    %c0_i32_1 = arith.constant 0 : i32
    return %c0_i32, %c0_i32_0 : i32, i32
  }
  func.func @transform_21(%arg0: i32) -> (i32, i32) {
    %c0_i32 = arith.constant 0 : i32
    %c0_i32_0 = arith.constant 0 : i32
    %c0_i32_1 = arith.constant 0 : i32
    return %c0_i32, %c0_i32_0 : i32, i32
  }
  func.func @transform_22(%arg0: i32) -> (i32, i32) {
    %c0_i32 = arith.constant 0 : i32
    %c0_i32_0 = arith.constant 0 : i32
    %c0_i32_1 = arith.constant 0 : i32
    return %c0_i32, %c0_i32_0 : i32, i32
  }
  func.func @transform_23(%arg0: i32) -> (i32, i32) {
    %c0_i32 = arith.constant 0 : i32
    %c0_i32_0 = arith.constant 0 : i32
    %c0_i32_1 = arith.constant 0 : i32
    return %c0_i32, %c0_i32_0 : i32, i32
  }
}

</mosaic_0001>

<bundles_post_ra>
// kernel: tpu_custom_call.1
= control target key start
LH: loop header
LB: loop body
LE: loop exit
PB: predicated region body
PF: predicated region fallthrough
CT: control target
= control target key end

     0   :  { %s4965_s0 = inlined_call_operand.vmem [shape: s32[16,1], index: 0, kind: input, shape index: {}]   ;;  %s4966_s1 = inlined_call_operand.hbm [shape: f32[16,16], index: 1, kind: input, shape index: {}]   ;;  %s4967_s2 = inlined_call_operand.vmem [shape: s32[16,1], index: 2, kind: input, shape index: {}]   ;;  %s4968_s3 = inlined_call_operand.vmem [shape: f32[64,32], index: 3, kind: input, shape index: {}]   ;;  %s4969_s4 = inlined_call_operand.vmem [shape: f32[16,32], index: 4, kind: input, shape index: {}]   ;;  %s4970_s5 = inlined_call_operand.hbm [shape: f32[1,32], index: 5, kind: input, shape index: {}]   ;;  %s4971_s6 = inlined_call_operand.hbm [shape: f32[1,32], index: 6, kind: input, shape index: {}]   ;;  %s4972_s7 = inlined_call_operand.hbm [shape: f32[1,32], index: 7, kind: input, shape index: {}]   ;;  %s4973_s8 = inlined_call_operand.vmem [shape: f32[2,32,96], index: 8, kind: input, shape index: {}]   ;;  %s4974_s9 = inlined_call_operand.vmem [shape: f32[2,1,96], index: 9, kind: input, shape index: {}]   ;;  %s4975_s10 = inlined_call_operand.vmem [shape: f32[2,32,32], index: 10, kind: input, shape index: {}]   ;;  %s4976_s11 = inlined_call_operand.vmem [shape: f32[2,1,32], index: 11, kind: input, shape index: {}]   ;;  %s4977_s12 = inlined_call_operand.vmem [shape: f32[2,1,32], index: 12, kind: input, shape index: {}]   ;;  %s4978_s13 = inlined_call_operand.vmem [shape: f32[2,1,32], index: 13, kind: input, shape index: {}]   ;;  %s4979_s14 = inlined_call_operand.vmem [shape: f32[2,32,64], index: 14, kind: input, shape index: {}]   ;;  %s4980_s15 = inlined_call_operand.vmem [shape: f32[2,1,64], index: 15, kind: input, shape index: {}]   ;;  %s4981_s16 = inlined_call_operand.vmem [shape: f32[2,64,32], index: 16, kind: input, shape index: {}]   ;;  %s4982_s17 = inlined_call_operand.vmem [shape: f32[2,1,32], index: 17, kind: input, shape index: {}]   ;;  %s4983_s18 = inlined_call_operand.vmem [shape: f32[2,1,32], index: 18, kind: input, shape index: {}]   ;;  %s4984_s19 = inlined_call_operand.vmem [shape: f32[2,1,32], index: 19, kind: input, shape index: {}]   ;;  %s4985_s20 = inlined_call_operand.vmem [shape: f32[32,128], index: 20, kind: input, shape index: {}]   ;;  %s4986_s21 = inlined_call_operand.vmem [shape: f32[1,128], index: 21, kind: input, shape index: {}]   ;;  %s4987_s22 = inlined_call_operand.hbm [shape: f32[16,128], index: 22, kind: output, shape index: {0}]   ;;  %s4988_s23 = inlined_call_operand.hbm [shape: f32[1,128], index: 23, kind: output, shape index: {1}]  }
   0x1   :  { %5007 = sst [smem:[#allocation18_spill]] %s4965_s0 }
   0x2   :  { %5008 = sst [smem:[#allocation19_spill]] %s4966_s1 }
   0x3   :  { %5009 = sst [smem:[#allocation20_spill]] %s4967_s2 }
   0x4   :  { %5010 = sst [smem:[#allocation21_spill]] %s4968_s3 }
   0x5   :  { %5011 = sst [smem:[#allocation22_spill]] %s4969_s4 }
   0x6   :  { %5012 = sst [smem:[#allocation23_spill]] %s4970_s5 }
   0x7   :  { %5013 = sst [smem:[#allocation24_spill]] %s4971_s6 }
   0x8   :  { %5014 = sst [smem:[#allocation25_spill]] %s4972_s7 }
   0x9   :  { %5015 = sst [smem:[#allocation26_spill]] %s4986_s21 }
   0xa   :  { %5016 = sst [smem:[#allocation27_spill]] %s4987_s22 }
   0xb   :  { %5017 = sst [smem:[#allocation28_spill]] %s4988_s23 }
   0xc   :  { %29 = vsyncpa [#allocation3], 0 }
   0xd   :  { %30 = vsyncpa [#allocation6], 0 }
   0xe   :  { %31 = vsyncpa [#allocation9], 0 }
   0xf   :  { %32 = vsyncpa [#allocation4], 0 }
  0x10   :  { %33 = vsyncpa [#allocation12], 0  ;;  %s4192_s4 = smov [#allocation5]   ;;  %s4193_s24 = smov [#allocation2]  }
  0x11   :  { %s60_s30 = sshll.u32 %s4192_s4, 4  ;;  %s41_s25 = sshll.u32 %s4193_s24, 4  ;;  %s61_s30 = int_to_ptr.vmem [resolvable:$true] %s60_s30  ;;  %s4335_s25 = int_to_ptr.vmem [resolvable:$true] %s41_s25 }
  0x12   :  { %s5018_s26 = sld [smem:[#allocation23_spill]] }
  0x18   :  { %s4050_s2 = scalar_lea.hbm %s5018_s26, 16 }
  0x19   :  { %p4051_p0 = scmp.ne.s32.totalorder %s5018_s26, %s4050_s2  ;;  %p4054_p1 = scmp.lt.u32.totalorder %s4050_s2, %s5018_s26 }
  0x1b   :  { %p4056_p2 = pnand %p4054_p1, %p4051_p0 }
  0x1d   :  { %4059 = shalt.err (!%p4056_p2)
}
  0x1e   :  { %s4060_s29 = scalar_lea.vmem %s61_s30, 16  ;;  %s4064_s3 = scalar_lea.vmem %s61_s30, 32 }
  0x1f   :  { %p4061_p3 = scmp.ne.s32.totalorder %s61_s30, %s4060_s29  ;;  %p4065_p4 = scmp.lt.s32.totalorder %s61_s30, %s61_s30 }
  0x20   :  { %p4066_p5 = scmp.lt.s32.totalorder %s4064_s3, %s4060_s29 }
  0x22   :  { %p4067_p6 = por %p4066_p5, %p4065_p4 }
  0x24   :  { %p4068_p7 = pnand %p4067_p6, %p4061_p3 }
  0x26   :  { %4071 = shalt.err (!%p4068_p7)
}
  0x27   :  { %63 = dma.hbm_to_vmem [thread:$0]  %s5018_s26, 16, %s61_s30, [#allocation6]  }
  0x28   :  { %s5019_s1 = sld [smem:[#allocation19_spill]] }
  0x2e   :  { %s4072_s6 = scalar_lea.hbm %s5019_s1, 256 }
  0x2f   :  { %p4073_p8 = scmp.ne.s32.totalorder %s5019_s1, %s4072_s6  ;;  %p4076_p9 = scmp.lt.u32.totalorder %s4072_s6, %s5019_s1 }
  0x31   :  { %p4078_p10 = pnand %p4076_p9, %p4073_p8 }
  0x33   :  { %4081 = shalt.err (!%p4078_p10)
}
  0x34   :  { %s4082_s29 = scalar_lea.vmem %s4335_s25, 256  ;;  %p4087_p12 = scmp.lt.s32.totalorder %s4335_s25, %s4335_s25 }
  0x35   :  { %p4083_p11 = scmp.ne.s32.totalorder %s4335_s25, %s4082_s29  ;;  %p4088_p13 = scmp.lt.s32.totalorder %s4082_s29, %s4082_s29 }
  0x37   :  { %p4089_p0 = por %p4088_p13, %p4087_p12 }
  0x39   :  { %p4090_p1 = pnand %p4089_p0, %p4083_p11 }
  0x3b   :  { %4093 = shalt.err (!%p4090_p1)
}
  0x3c   :  { %s4999_s30 = smov 128   ;;  %s5002_s26 = smov 8  }
  0x3d   :  { %47 = dma.hbm_to_vmem [thread:$0]  %s5019_s1, 256, %s4335_s25, [#allocation3], %s4999_s30, %s4999_s30, %s5002_s26  }
  0x3e   :  { %s4196_s4 = smov [#allocation7]   ;;  %s4197_s5 = smov [#allocation8]  }
  0x3f   :  { %s70_s24 = sshll.u32 %s4196_s4, 4  ;;  %s80_s6 = sshll.u32 %s4197_s5, 4  ;;  %s71_s24 = int_to_ptr.vmem [resolvable:$true] %s70_s24  ;;  %s81_s6 = int_to_ptr.vmem [resolvable:$true] %s80_s6 }
  0x40   :  { %s5020_s7 = sld [smem:[#allocation24_spill]] }
  0x46   :  { %s4094_s28 = scalar_lea.hbm %s5020_s7, 16 }
  0x47   :  { %p4095_p2 = scmp.ne.s32.totalorder %s5020_s7, %s4094_s28  ;;  %p4098_p3 = scmp.lt.u32.totalorder %s4094_s28, %s5020_s7 }
  0x49   :  { %p4100_p4 = pnand %p4098_p3, %p4095_p2 }
  0x4b   :  { %4103 = shalt.err (!%p4100_p4)
}
  0x4c   :  { %s4104_s25 = scalar_lea.vmem %s71_s24, 16  ;;  %s4108_s1 = scalar_lea.vmem %s71_s24, 32 }
  0x4d   :  { %p4105_p5 = scmp.ne.s32.totalorder %s71_s24, %s4104_s25  ;;  %p4109_p6 = scmp.lt.s32.totalorder %s71_s24, %s71_s24 }
  0x4e   :  { %p4110_p7 = scmp.lt.s32.totalorder %s4108_s1, %s4104_s25 }
  0x50   :  { %p4111_p8 = por %p4110_p7, %p4109_p6 }
  0x52   :  { %p4112_p9 = pnand %p4111_p8, %p4105_p5 }
  0x54   :  { %4115 = shalt.err (!%p4112_p9)
}
  0x55   :  { %73 = dma.hbm_to_vmem [thread:$0]  %s5020_s7, 16, %s71_s24, [#allocation6]  }
  0x56   :  { %s5021_s5 = sld [smem:[#allocation25_spill]] }
  0x5c   :  { %s4116_s27 = scalar_lea.hbm %s5021_s5, 16 }
  0x5d   :  { %p4117_p10 = scmp.ne.s32.totalorder %s5021_s5, %s4116_s27  ;;  %p4120_p11 = scmp.lt.u32.totalorder %s4116_s27, %s5021_s5 }
  0x5f   :  { %p4122_p12 = pnand %p4120_p11, %p4117_p10 }
  0x61   :  { %4125 = shalt.err (!%p4122_p12)
}
  0x62   :  { %s4126_s29 = scalar_lea.vmem %s81_s6, 16  ;;  %s4130_s25 = scalar_lea.vmem %s81_s6, 32 }
  0x63   :  { %p4127_p13 = scmp.ne.s32.totalorder %s81_s6, %s4126_s29  ;;  %p4131_p0 = scmp.lt.s32.totalorder %s81_s6, %s81_s6 }
  0x64   :  { %p4132_p1 = scmp.lt.s32.totalorder %s4130_s25, %s4126_s29 }
  0x66   :  { %p4133_p2 = por %p4132_p1, %p4131_p0 }
  0x68   :  { %p4134_p3 = pnand %p4133_p2, %p4127_p13 }
  0x6a   :  { %4137 = shalt.err (!%p4134_p3)
}
  0x6b   :  { %83 = dma.hbm_to_vmem [thread:$0]  %s5021_s5, 16, %s81_s6, [#allocation9]  }
  0x6c   :  { %4182 = dma.done.wait [#allocation3], 256  }
  0x6d   :  { %4183 = vsyncadd [#allocation3], 4294967040 }
  0x6e   :  { %4184 = dma.done.wait [#allocation6], 32  }
  0x6f   :  { %4185 = vsyncadd [#allocation6], 4294967264 }
  0x70   :  { %4186 = dma.done.wait [#allocation9], 16  }
  0x71   :  { %4187 = vsyncadd [#allocation9], 4294967280  ;;  %v4198_v0 = vmov 0   ;;  %s5022_s0 = sld [smem:[#allocation18_spill]]  ;;  %s5023_s27 = sld [smem:[#allocation21_spill]]  ;;  %v126_v15 = vlaneseq  ;;  %vm150_vm0 = vcmask 523264  }
  0x72   :  { %3866 = vset.pattern.permute.xlu0 %v4198_v0  ;;  %3947 = vset.pattern.permute.xlu1 %v4198_v0  ;;  %v4199_v18 = vmov 0.0   ;;  %s5024_s5 = sld [smem:[#allocation22_spill]]  ;;  %v3155_v26 = vld [vmem:[#allocation5] ss:$0 sm:$0xff]  ;;  %vm243_vm3 = vcmask 261120   ;;  %v289_v43 = vld [vmem:[%s4973_s8] sm:$0xff] }
  0x73   :  { %v4423_v16 = vand.u32 127, %v126_v15  ;;  %v290_v44 = vld [vmem:[%s4973_s8 + $0x8] sm:$0xff]  ;;  %v291_v45 = vld [vmem:[%s4973_s8 + $0x10] sm:$0xff]  ;;  %v292_v47 = vld [vmem:[%s4973_s8 + $0x18] sm:$0xff]  ;;  %vm387_vm4 = vcmask 64512   ;;  %s4200_s21 = smov 96  }
  0x74   :  { %v3671_v46 = vpack.c.bf16 %v290_v44, %v289_v43  ;;  %v3675_v48 = vpack.c.bf16 %v292_v47, %v291_v45  ;;  %v3156_v56 = vld [vmem:[#allocation7] ss:$0 sm:$0xff]  ;;  %v3157_v58 = vld [vmem:[#allocation8] ss:$0 sm:$0xff]  ;;  %vm4478_vm5 = vmpackc.low %vm387_vm4, %vm387_vm4  ;;  %vm475_vm6 = vcmask 130048   ;;  %s4202_s6 = smov 64  }
  0x75   :  { %s4204_s22 = smov 56   ;;  %s4205_s2 = smov 112   ;;  %vm1225_vm7 = vcmask 195584   ;;  %vm3086_vm12 = vcmask 7168  }
  0x76   :  { %3672 = vmatprep.subr.bf16.mxu1 %v3671_v46  ;;  %s4206_s28 = smov 80   ;;  %s4207_s29 = smov 48  }
  0x77   :  { %v124_v1 = vld [vmem:[%s5022_s0] sm:$0xff]  ;;  %v141_v3 = vld [vmem:[%s5023_s27 + $0x8] sm:$0xff]  ;;  %v142_v4 = vld [vmem:[%s5023_s27 + $0x10] sm:$0xff]  ;;  %3674 = vmatpush3.bf16.msra.mxu1 %v3671_v46  ;;  %s4208_s25 = smov 104   ;;  %s4209_s24 = smov 72  }
  0x78   :  { %v140_v2 = vld [vmem:[%s5023_s27] sm:$0xff]  ;;  %129 = vperm.xlu0 %3866, %v124_v1   ;;  %v143_v5 = vld [vmem:[%s5023_s27 + $0x18] sm:$0xff]  ;;  %v125_v6 = vld [vmem:[%s5022_s0 + $0x8] sm:$0xff]  ;;  %3676 = vmatprep.subr.bf16.mxu1 %v3675_v48  ;;  %s5004_s7 = smov 40   ;;  %s5000_s1 = smov 16  }
  0x79   :  { %v3655_v7 = vpack.c.bf16 %v141_v3, %v140_v2  ;;  %v3659_v8 = vpack.c.bf16 %v143_v5, %v142_v4  ;;  %v144_v9 = vld [vmem:[%s5023_s27 + $0x20] sm:$0xff]  ;;  %v145_v10 = vld [vmem:[%s5023_s27 + $0x28] sm:$0xff]  ;;  %v146_v12 = vld [vmem:[%s5023_s27 + $0x30] sm:$0xff]  ;;  %s5005_s3 = smov 24   ;;  %s5030_s0 = smov 24  }
  0x7a   :  { %v3663_v11 = vpack.c.bf16 %v145_v10, %v144_v9  ;;  %v147_v13 = vld [vmem:[%s5023_s27 + $0x38] sm:$0xff]  ;;  %v149_v22 = vld [vmem:[%s5024_s5 + $0x8] sm:$0xff]  ;;  %v148_v23 = vld [vmem:[%s5024_s5] sm:$0xff]  ;;  %s4201_s27 = smov 88   ;;  %s4203_s5 = smov 120  }
  0x7b   :  { %3656 = vmatprep.subr.bf16.mxu0 %v3655_v7  ;;  %v3667_v14 = vpack.c.bf16 %v147_v13, %v146_v12  ;;  %3678 = vmatpush3.bf16.msra.mxu1 %v3675_v48  ;;  %v3158_v1 = vld [vmem:[%s4974_s9] ss:$0 sm:$0xff] }
  0x7c   :  { %132 = vperm.xlu0 %3866, %v125_v6   ;;  %3658 = vmatpush3.bf16.msra.mxu0 %v3655_v7  ;;  %v4488_v13 = vld [vmem:[#allocation2 + $0x8] sm:$0xff] }
  0x7d   :  { %3660 = vmatprep.subr.bf16.mxu0 %v3659_v8 }
  0x80   :  { %3662 = vmatpush3.bf16.msra.mxu0 %v3659_v8 }
  0x81   :  { %3664 = vmatprep.subr.bf16.mxu0 %v3663_v11 }
  0x84   :  { %3666 = vmatpush3.bf16.msra.mxu0 %v3663_v11 }
  0x85   :  { %3668 = vmatprep.subr.bf16.mxu0 %v3667_v14 }
  0x88   :  { %3670 = vmatpush3.bf16.msra.mxu0 %v3667_v14 }
  0xf7   :  { %v130_v17 = vpop.permute.xlu0 %129 }
  0xf8   :  { %vm134_vm1 = vcmp.eq.s32.totalorder %v130_v17, %v4423_v16  ;;  %v4490_v17 = vld [vmem:[#allocation2] sm:$0xff] }
  0xf9   :  { %v3151_v19 = vsel %vm134_vm1, 1.0, %v4199_v18 }
  0xfa   :  { %3425 = vmatprep.mubr.msk.f32.mxu0 %vm150_vm0, %v3151_v19 }
  0xfb   :  { %v133_v20 = vpop.permute.xlu0 %132 }
  0xfc   :  { %vm135_vm2 = vcmp.eq.s32.totalorder %v133_v20, %v4423_v16 }
  0xfd   :  { %v3152_v21 = vsel %vm135_vm2, 1.0, %v4199_v18 }
  0xfe   :  { %3426 = vmatmul.mubr.msk.f32.vlgmr.msra.gmra.mrb[0].mxu0 %vm150_vm0, %v3152_v21 }
 0x1d1   :  { %v3427_v24 = vpop.f32.mrb[0].mxu0 }
 0x1d2   :  { %v223_v25 = vpop.f32.mrb[1].mxu0  ;;  %v229_v27 = vadd.f32 %v3427_v24, %v149_v22 }
 0x1d3   :  { %v224_v28 = vadd.f32 %v223_v25, %v148_v23 }
 0x1d4   :  { %v240_v31 = vadd.f32 %v3155_v26, %v229_v27 }
 0x1d5   :  { %v239_v29 = vadd.f32 %v3155_v26, %v224_v28 }
 0x1d6   :  { %v247_v32 = vsel %vm243_vm3, %v240_v31, 0.0 }
 0x1d7   :  { %v244_v30 = vsel %vm243_vm3, %v239_v29, 0.0 }
 0x1d8   :  { %245 = vadd.xlane.f32.xlu1 %v244_v30 }
 0x1dc   :  { %248 = vadd.xlane.f32.xlu1 %v247_v32 }
 0x265   :  { %v246_v33 = vpop.xlane.xlu1 %245 }
 0x266   :  { %v251_v34 = vmul.f32 0.03125, %v246_v33 }
 0x268   :  { %v253_v35 = vsub.f32 %v239_v29, %v251_v34 }
 0x269   :  { %v249_v36 = vpop.xlane.xlu1 %248 }
 0x26a   :  { %v252_v37 = vmul.f32 0.03125, %v249_v36  ;;  %v255_v38 = vmul.f32 %v253_v35, %v253_v35 }
 0x26c   :  { %v254_v39 = vsub.f32 %v240_v31, %v252_v37  ;;  %v257_v40 = vsel %vm243_vm3, %v255_v38, 0.0 }
 0x26d   :  { %258 = vadd.xlane.f32.xlu0 %v257_v40 }
 0x26e   :  { %v256_v41 = vmul.f32 %v254_v39, %v254_v39 }
 0x270   :  { %v260_v42 = vsel %vm243_vm3, %v256_v41, 0.0 }
 0x271   :  { %261 = vadd.xlane.f32.xlu1 %v260_v42 }
 0x2fa   :  { %v259_v49 = vpop.xlane.xlu0 %258 }
 0x2fb   :  { %v263_v50 = vmul.f32 0.03125, %v259_v49 }
 0x2fd   :  { %v265_v51 = vadd.f32 1e-12, %v263_v50 }
 0x2fe   :  { %v262_v52 = vpop.xlane.xlu1 %261 }
 0x2ff   :  { %3948 = vrsqrt.f32 %v265_v51  ;;  %v264_v53 = vmul.f32 0.03125, %v262_v52 }
 0x301   :  { %v266_v54 = vadd.f32 1e-12, %v264_v53 }
 0x303   :  { %3950 = vrsqrt.f32 %v266_v54 }
 0x309   :  { %v3949_v55 = vpop.eup %3948 }
 0x30a   :  { %v269_v57 = vmul.f32 %v3949_v55, %v253_v35 }
 0x30c   :  { %v277_v59 = vmul.f32 %v3156_v56, %v269_v57 }
 0x30d   :  { %v3951_v60 = vpop.eup %3950 }
 0x30e   :  { %v270_v61 = vmul.f32 %v3951_v60, %v254_v39  ;;  %v4453_v62 = vadd.f32 %v3157_v58, %v277_v59 }
 0x310   :  { %v278_v63 = vmul.f32 %v3156_v56, %v270_v61  ;;  %3436 = vmatprep.mubr.msk.f32.mxu1 %vm243_vm3, %v4453_v62 }
 0x312   :  { %v4457_v0 = vadd.f32 %v3157_v58, %v278_v63 }
 0x314   :  { %3437 = vmatmul.mubr.msk.f32.vlgmr.msra.gmra.mrb[0].mxu1 %vm243_vm3, %v4457_v0 }
 0x3e7   :  { %v3438_v2 = vpop.f32.mrb[0].mxu1 }
 0x3e8   :  { %v4464_v3 = vadd.f32 %v3438_v2, %v3158_v1  ;;  %v372_v4 = vpop.f32.mrb[1].mxu1 }
 0x3e9   :  { %v4466_v5 = vadd.f32 %v3158_v1, %v372_v4 }
 0x3eb   :  { %3443 = vmatprep.mubr.msk.f32.mxu1 %vm387_vm4, %v4466_v5  ;;  %v4472_v6 = vpack.i.bf16 %v4464_v3, %v4466_v5 }
 0x3ed   :  { %3868 = vrot.lane.b32.xlu1 %v4472_v6, %s4200_s21 }
 0x45f   :  { %v3869_v7 = vpop.permute.xlu1 %3868 }
 0x460   :  { %v3871_v8 = vunpack.i.h.bf16 %v3869_v7  ;;  %v3870_v9 = vunpack.i.l.bf16 %v3869_v7 }
 0x462   :  { %v3679_v11 = vpack.c.bf16 %v3871_v8, %v3870_v9 }
 0x464   :  { %3681 = vmatprep.subr.msk.bf16.mxu1 %vm4478_vm5, %v3679_v11 }
 0x465   :  { %3684 = vmatpush3.bf16.xpose.msk.msra.mxu1 %vm4478_vm5, %v3679_v11 }
 0x46c   :  { %3444 = vmatmul.mubr.msk.f32.vlgmr.msra.gmra.mrb[2].mxu1 %vm387_vm4, %v4464_v3 }
 0x53f   :  { %v3445_v12 = vpop.f32.mrb[2].mxu1 }
 0x540   :  { %v472_v14 = vmul.f32 0.35355338, %v3445_v12  ;;  %v462_v15 = vpop.f32.mrb[3].mxu1 }
 0x541   :  { %v471_v19 = vmul.f32 0.35355338, %v462_v15 }
 0x542   :  { %v474_v20 = vadd.f32 %v472_v14, %v4488_v13 }
 0x543   :  { %v473_v21 = vadd.f32 %v471_v19, %v4490_v17 }
 0x544   :  { %v479_v22 = vsel %vm475_vm6, %v474_v20, -inf }
 0x545   :  { %480 = vmax.xlane.f32.xlu0 %v479_v22  ;;  %v476_v23 = vsel %vm475_vm6, %v473_v21, -inf }
 0x546   :  { %477 = vmax.xlane.f32.xlu1 %v476_v23 }
 0x557   :  { %3878 = vrot.lane.b32.xlu1 %v4472_v6, %s4201_s27 }
 0x55b   :  { %3873 = vrot.lane.b32.xlu0 %v4472_v6, %s4202_s6 }
 0x5d2   :  { %v481_v24 = vpop.xlane.xlu0 %480 }
 0x5d3   :  { %v483_v25 = vsub.f32 %v474_v20, %v481_v24  ;;  %v478_v26 = vpop.xlane.xlu1 %477 }
 0x5d4   :  { %v482_v27 = vsub.f32 %v473_v21, %v478_v26 }
 0x5d5   :  { %v486_v28 = vmul.f32 1.442695, %v483_v25 }
 0x5d6   :  { %v484_v29 = vmul.f32 1.442695, %v482_v27  ;;  %v3874_v30 = vpop.permute.xlu0 %3873 }
 0x5d7   :  { %3952 = vpow2.f32 %v486_v28  ;;  %v3876_v31 = vunpack.i.h.bf16 %v3874_v30  ;;  %v3875_v32 = vunpack.i.l.bf16 %v3874_v30  ;;  %v3879_v33 = vpop.permute.xlu1 %3878 }
 0x5d8   :  { %v3881_v34 = vunpack.i.h.bf16 %v3879_v33  ;;  %v3880_v35 = vunpack.i.l.bf16 %v3879_v33  ;;  %3954 = vpow2.f32 %v484_v29 }
 0x5d9   :  { %v3685_v36 = vpack.c.bf16 %v3876_v31, %v3875_v32 }
 0x5da   :  { %v3689_v37 = vpack.c.bf16 %v3881_v34, %v3880_v35 }
 0x5db   :  { %3686 = vmatprep.subr.bf16.mxu1 %v3685_v36 }
 0x5dc   :  { %3688 = vmatpush3.bf16.msra.mxu1 %v3685_v36 }
 0x5dd   :  { %3691 = vmatprep.subr.msk.bf16.mxu1 %vm4478_vm5, %v3689_v37 }
 0x5e1   :  { %v3953_v38 = vpop.eup %3952 }
 0x5e2   :  { %v491_v39 = vsel %vm475_vm6, %v3953_v38, 0.0  ;;  %v3955_v40 = vpop.eup %3954 }
 0x5e3   :  { %492 = vadd.xlane.f32.xlu0 %v491_v39  ;;  %v488_v41 = vsel %vm475_vm6, %v3955_v40, 0.0 }
 0x5e7   :  { %489 = vadd.xlane.f32.xlu0 %v488_v41 }
 0x5fd   :  { %585 = vrot.lane.b32.xlu0 %v4466_v5, %s4203_s5 }
 0x601   :  { %587 = vrot.lane.b32.xlu0 %v4464_v3, %s4203_s5 }
 0x670   :  { %v493_v42 = vpop.xlane.xlu0 %492 }
 0x671   :  { %3956 = vrcp.f32 %v493_v42 }
 0x674   :  { %v490_v43 = vpop.xlane.xlu0 %489 }
 0x675   :  { %3958 = vrcp.f32 %v490_v43 }
 0x678   :  { %v586_v48 = vpop.permute.xlu0 %585 }
 0x67b   :  { %v3957_v44 = vpop.eup %3956 }
 0x67c   :  { %v497_v47 = vmul.f32 %v3957_v44, %v3953_v38  ;;  %v588_v49 = vpop.permute.xlu0 %587 }
 0x67f   :  { %v3959_v45 = vpop.eup %3958 }
 0x680   :  { %v495_v46 = vmul.f32 %v3959_v45, %v3955_v40 }
 0x682   :  { %3450 = vmatprep.mubr.msk.f32.mxu1 %vm475_vm6, %v495_v46 }
 0x683   :  { %3451 = vmatmul.mubr.msk.f32.vlgmr.msra.gmra.mrb[4].mxu1 %vm475_vm6, %v497_v47 }
 0x684   :  { %3694 = vmatpush3.bf16.xpose.msk.msra.mxu1 %vm4478_vm5, %v3689_v37  ;;  %3457 = vmatprep.mubr.msk.f32.mxu1 %vm387_vm4, %v586_v48 }
 0x68b   :  { %3458 = vmatmul.mubr.msk.f32.vlgmr.msra.gmra.mrb[6].mxu1 %vm387_vm4, %v588_v49 }
 0x756   :  { %v4514_v50 = vpop.f32.mrb[4].mxu1 }
 0x757   :  { %v4516_v51 = vpop.f32.mrb[5].mxu1 }
 0x75e   :  { %v3459_v52 = vpop.f32.mrb[6].mxu1 }
 0x75f   :  { %v677_v53 = vmul.f32 0.35355338, %v3459_v52  ;;  %v667_v54 = vpop.f32.mrb[7].mxu1 }
 0x760   :  { %v676_v55 = vmul.f32 0.35355338, %v667_v54 }
 0x761   :  { %v679_v56 = vadd.f32 %v677_v53, %v4488_v13 }
 0x762   :  { %v678_v57 = vadd.f32 %v676_v55, %v4490_v17 }
 0x763   :  { %v683_v58 = vsel %vm475_vm6, %v679_v56, -inf }
 0x764   :  { %684 = vmax.xlane.f32.xlu1 %v683_v58  ;;  %v680_v59 = vsel %vm475_vm6, %v678_v57, -inf }
 0x765   :  { %681 = vmax.xlane.f32.xlu0 %v680_v59 }
 0x775   :  { %3883 = vrot.lane.b32.xlu1 %v4472_v6, %s4204_s22 }
 0x779   :  { %789 = vrot.lane.b32.xlu1 %v4466_v5, %s4205_s2 }
 0x77d   :  { %791 = vrot.lane.b32.xlu1 %v4464_v3, %s4205_s2 }
 0x7f1   :  { %v685_v60 = vpop.xlane.xlu1 %684 }
 0x7f2   :  { %v687_v61 = vsub.f32 %v679_v56, %v685_v60  ;;  %v682_v63 = vpop.xlane.xlu0 %681 }
 0x7f3   :  { %v686_v1 = vsub.f32 %v678_v57, %v682_v63 }
 0x7f4   :  { %v690_v2 = vmul.f32 1.442695, %v687_v61 }
 0x7f5   :  { %v688_v4 = vmul.f32 1.442695, %v686_v1  ;;  %v3884_v7 = vpop.permute.xlu1 %3883 }
 0x7f6   :  { %3960 = vpow2.f32 %v690_v2  ;;  %v3886_v8 = vunpack.i.h.bf16 %v3884_v7  ;;  %v3885_v9 = vunpack.i.l.bf16 %v3884_v7 }
 0x7f7   :  { %3962 = vpow2.f32 %v688_v4 }
 0x7f8   :  { %v3695_v11 = vpack.c.bf16 %v3886_v8, %v3885_v9 }
 0x7f9   :  { %v790_v30 = vpop.permute.xlu1 %789 }
 0x7fa   :  { %3696 = vmatprep.subr.bf16.mxu0 %v3695_v11 }
 0x7fb   :  { %3698 = vmatpush3.bf16.msra.mxu0 %v3695_v11 }
 0x7fd   :  { %v792_v31 = vpop.permute.xlu1 %791 }
 0x800   :  { %v3961_v12 = vpop.eup %3960 }
 0x801   :  { %v695_v14 = vsel %vm475_vm6, %v3961_v12, 0.0  ;;  %v3963_v15 = vpop.eup %3962 }
 0x802   :  { %696 = vadd.xlane.f32.xlu0 %v695_v14  ;;  %v692_v19 = vsel %vm475_vm6, %v3963_v15, 0.0 }
 0x806   :  { %693 = vadd.xlane.f32.xlu0 %v692_v19 }
 0x81c   :  { %3888 = vrot.lane.b32.xlu0 %v4472_v6, %s4206_s28 }
 0x88f   :  { %v697_v20 = vpop.xlane.xlu0 %696 }
 0x890   :  { %3964 = vrcp.f32 %v697_v20 }
 0x893   :  { %v694_v21 = vpop.xlane.xlu0 %693 }
 0x894   :  { %3966 = vrcp.f32 %v694_v21 }
 0x897   :  { %v3889_v22 = vpop.permute.xlu0 %3888 }
 0x898   :  { %v3891_v23 = vunpack.i.h.bf16 %v3889_v22  ;;  %v3890_v24 = vunpack.i.l.bf16 %v3889_v22 }
 0x89a   :  { %v3699_v25 = vpack.c.bf16 %v3891_v23, %v3890_v24  ;;  %v3965_v26 = vpop.eup %3964 }
 0x89b   :  { %v701_v29 = vmul.f32 %v3965_v26, %v3961_v12 }
 0x89c   :  { %3701 = vmatprep.subr.msk.bf16.mxu0 %vm4478_vm5, %v3699_v25 }
 0x89e   :  { %v3967_v27 = vpop.eup %3966 }
 0x89f   :  { %v699_v28 = vmul.f32 %v3967_v27, %v3963_v15 }
 0x8a1   :  { %3464 = vmatprep.mubr.msk.f32.mxu0 %vm475_vm6, %v699_v28 }
 0x8a2   :  { %3465 = vmatmul.mubr.msk.f32.vlgmr.msra.gmra.mrb[2].mxu0 %vm475_vm6, %v701_v29 }
 0x8a3   :  { %3704 = vmatpush3.bf16.xpose.msk.msra.mxu0 %vm4478_vm5, %v3699_v25  ;;  %3471 = vmatprep.mubr.msk.f32.mxu0 %vm387_vm4, %v790_v30 }
 0x8aa   :  { %3472 = vmatmul.mubr.msk.f32.vlgmr.msra.gmra.mrb[4].mxu0 %vm387_vm4, %v792_v31 }
 0x975   :  { %v4540_v32 = vpop.f32.mrb[2].mxu0 }
 0x976   :  { %v4542_v33 = vpop.f32.mrb[3].mxu0 }
 0x97d   :  { %v3473_v34 = vpop.f32.mrb[4].mxu0 }
 0x97e   :  { %v881_v35 = vmul.f32 0.35355338, %v3473_v34  ;;  %v871_v36 = vpop.f32.mrb[5].mxu0 }
 0x97f   :  { %v880_v37 = vmul.f32 0.35355338, %v871_v36 }
 0x980   :  { %v883_v38 = vadd.f32 %v881_v35, %v4488_v13 }
 0x981   :  { %v882_v39 = vadd.f32 %v880_v37, %v4490_v17 }
 0x982   :  { %v887_v40 = vsel %vm475_vm6, %v883_v38, -inf }
 0x983   :  { %888 = vmax.xlane.f32.xlu1 %v887_v40  ;;  %v884_v41 = vsel %vm475_vm6, %v882_v39, -inf }
 0x984   :  { %885 = vmax.xlane.f32.xlu0 %v884_v41 }
 0x994   :  { %3893 = vrot.lane.b32.xlu1 %v4472_v6, %s4207_s29 }
 0x998   :  { %993 = vrot.lane.b32.xlu1 %v4466_v5, %s4208_s25 }
 0x99c   :  { %995 = vrot.lane.b32.xlu1 %v4464_v3, %s4208_s25 }
 0xa10   :  { %v889_v42 = vpop.xlane.xlu1 %888 }
 0xa11   :  { %v891_v43 = vsub.f32 %v883_v38, %v889_v42  ;;  %v886_v44 = vpop.xlane.xlu0 %885 }
 0xa12   :  { %v890_v45 = vsub.f32 %v882_v39, %v886_v44  ;;  %v1228_v44 = vld [vmem:[%s4975_s10] sm:$0xff] }
 0xa13   :  { %v894_v46 = vmul.f32 1.442695, %v891_v43 }
 0xa14   :  { %v892_v47 = vmul.f32 1.442695, %v890_v45  ;;  %v3894_v48 = vpop.permute.xlu1 %3893  ;;  %v1230_v45 = vld [vmem:[%s4975_s10 + $0x10] sm:$0xff] }
 0xa15   :  { %3968 = vpow2.f32 %v894_v46  ;;  %v3896_v49 = vunpack.i.h.bf16 %v3894_v48  ;;  %v3895_v52 = vunpack.i.l.bf16 %v3894_v48 }
 0xa16   :  { %3970 = vpow2.f32 %v892_v47  ;;  %v1231_v47 = vld [vmem:[%s4975_s10 + $0x18] sm:$0xff] }
 0xa17   :  { %v3705_v53 = vpack.c.bf16 %v3896_v49, %v3895_v52  ;;  %v3723_v48 = vpack.c.bf16 %v1231_v47, %v1230_v45  ;;  %v1468_v45 = vld [vmem:[%s4981_s16] sm:$0xff] }
 0xa18   :  { %v994_v7 = vpop.permute.xlu1 %993 }
 0xa19   :  { %3706 = vmatprep.subr.bf16.mxu1 %v3705_v53 }
 0xa1a   :  { %3708 = vmatpush3.bf16.msra.mxu1 %v3705_v53 }
 0xa1c   :  { %v996_v8 = vpop.permute.xlu1 %995 }
 0xa1f   :  { %v3969_v54 = vpop.eup %3968 }
 0xa20   :  { %v899_v5 = vsel %vm475_vm6, %v3969_v54, 0.0  ;;  %v3971_v55 = vpop.eup %3970 }
 0xa21   :  { %900 = vadd.xlane.f32.xlu0 %v899_v5  ;;  %v896_v3 = vsel %vm475_vm6, %v3971_v55, 0.0 }
 0xa25   :  { %897 = vadd.xlane.f32.xlu0 %v896_v3 }
 0xa3b   :  { %3898 = vrot.lane.b32.xlu0 %v4472_v6, %s4209_s24 }
 0xaae   :  { %v901_v56 = vpop.xlane.xlu0 %900 }
 0xaaf   :  { %3972 = vrcp.f32 %v901_v56 }
 0xab2   :  { %v898_v57 = vpop.xlane.xlu0 %897 }
 0xab3   :  { %3974 = vrcp.f32 %v898_v57 }
 0xab6   :  { %v3899_v58 = vpop.permute.xlu0 %3898 }
 0xab7   :  { %v3901_v59 = vunpack.i.h.bf16 %v3899_v58  ;;  %v3900_v60 = vunpack.i.l.bf16 %v3899_v58 }
 0xab9   :  { %v3709_v61 = vpack.c.bf16 %v3901_v59, %v3900_v60  ;;  %v3973_v63 = vpop.eup %3972 }
 0xaba   :  { %v905_v4 = vmul.f32 %v3973_v63, %v3969_v54 }
 0xabb   :  { %3711 = vmatprep.subr.msk.bf16.mxu1 %vm4478_vm5, %v3709_v61 }
 0xabd   :  { %v3975_v1 = vpop.eup %3974 }
 0xabe   :  { %v903_v2 = vmul.f32 %v3975_v1, %v3971_v55 }
 0xac0   :  { %3478 = vmatprep.mubr.msk.f32.mxu1 %vm475_vm6, %v903_v2 }
 0xac1   :  { %3479 = vmatmul.mubr.msk.f32.vlgmr.msra.gmra.mrb[8].mxu1 %vm475_vm6, %v905_v4 }
 0xac2   :  { %3714 = vmatpush3.bf16.xpose.msk.msra.mxu1 %vm4478_vm5, %v3709_v61  ;;  %3485 = vmatprep.mubr.msk.f32.mxu1 %vm387_vm4, %v994_v7 }
 0xac9   :  { %3486 = vmatmul.mubr.msk.f32.vlgmr.msra.gmra.mrb[10].mxu1 %vm387_vm4, %v996_v8 }
 0xb94   :  { %v3480_v9 = vpop.f32.mrb[8].mxu1 }
 0xb95   :  { %v984_v11 = vpop.f32.mrb[9].mxu1 }
 0xb9c   :  { %v3487_v12 = vpop.f32.mrb[10].mxu1 }
 0xb9d   :  { %v1085_v14 = vmul.f32 0.35355338, %v3487_v12  ;;  %v1075_v15 = vpop.f32.mrb[11].mxu1 }
 0xb9e   :  { %v1084_v19 = vmul.f32 0.35355338, %v1075_v15 }
 0xb9f   :  { %v1087_v20 = vadd.f32 %v1085_v14, %v4488_v13 }
 0xba0   :  { %v1086_v21 = vadd.f32 %v1084_v19, %v4490_v17 }
 0xba1   :  { %v1091_v22 = vsel %vm475_vm6, %v1087_v20, -inf }
 0xba2   :  { %1092 = vmax.xlane.f32.xlu1 %v1091_v22  ;;  %v1088_v23 = vsel %vm475_vm6, %v1086_v21, -inf }
 0xba3   :  { %1089 = vmax.xlane.f32.xlu0 %v1088_v23 }
 0xbb3   :  { %3903 = vrot.lane.b32.xlu1 %v4472_v6, %s5004_s7 }
 0xbb7   :  { %1201 = vrot.lane.b32.xlu1 %v4540_v32, %s5002_s26 }
 0xbbb   :  { %1207 = vrot.lane.b32.xlu1 %v984_v11, %s5000_s1 }
 0xc2f   :  { %v1093_v24 = vpop.xlane.xlu1 %1092 }
 0xc30   :  { %v1095_v25 = vsub.f32 %v1087_v20, %v1093_v24  ;;  %v1090_v26 = vpop.xlane.xlu0 %1089 }
 0xc31   :  { %v1094_v27 = vsub.f32 %v1086_v21, %v1090_v26 }
 0xc32   :  { %v1098_v28 = vmul.f32 1.442695, %v1095_v25  ;;  %v1367_v25 = vld [vmem:[%s4979_s14 + $0x8] sm:$0xff] }
 0xc33   :  { %v1096_v29 = vmul.f32 1.442695, %v1094_v27  ;;  %v3904_v30 = vpop.permute.xlu1 %3903  ;;  %v1368_v27 = vld [vmem:[%s4979_s14 + $0x10] sm:$0xff] }
 0xc34   :  { %v3906_v31 = vunpack.i.h.bf16 %v3904_v30  ;;  %v3905_v34 = vunpack.i.l.bf16 %v3904_v30 }
 0xc35   :  { %3976 = vpow2.f32 %v1096_v29 }
 0xc36   :  { %v3715_v35 = vpack.c.bf16 %v3906_v31, %v3905_v34  ;;  %3978 = vpow2.f32 %v1098_v28  ;;  %v1369_v28 = vld [vmem:[%s4979_s14 + $0x18] sm:$0xff] }
 0xc37   :  { %v1202_v54 = vpop.permute.xlu1 %1201  ;;  %v3731_v29 = vpack.c.bf16 %v1369_v28, %v1368_v27 }
 0xc38   :  { %3716 = vmatprep.subr.bf16.mxu0 %v3715_v35  ;;  %v1222_v57 = vsel %vm387_vm4, %v4514_v50, %v1202_v54  ;;  %v1473_v54 = vld [vmem:[%s4981_s16 + $0x28] sm:$0xff] }
 0xc39   :  { %3718 = vmatpush3.bf16.msra.mxu0 %v3715_v35 }
 0xc3b   :  { %v1208_v55 = vpop.permute.xlu1 %1207 }
 0xc3f   :  { %v3977_v6 = vpop.eup %3976 }
 0xc40   :  { %v1100_v32 = vsel %vm475_vm6, %v3977_v6, 0.0  ;;  %v3979_v36 = vpop.eup %3978 }
 0xc41   :  { %1101 = vadd.xlane.f32.xlu0 %v1100_v32  ;;  %v1103_v37 = vsel %vm475_vm6, %v3979_v36, 0.0 }
 0xc45   :  { %1104 = vadd.xlane.f32.xlu0 %v1103_v37  ;;  %v3188_v37 = vld [vmem:[%s4977_s12] ss:$0 sm:$0xff] }
 0xc5b   :  { %1199 = vrot.lane.b32.xlu0 %v4542_v33, %s5002_s26  ;;  %v1229_v33 = vld [vmem:[%s4975_s10 + $0x8] sm:$0xff] }
 0xc5c   :  { %v3719_v46 = vpack.c.bf16 %v1229_v33, %v1228_v44 }
 0xc5e   :  { %3720 = vmatprep.subr.bf16.mxu0 %v3719_v46 }
 0xc5f   :  { %1209 = vrot.lane.b32.xlu0 %v3480_v9, %s5000_s1 }
 0xcce   :  { %v1102_v38 = vpop.xlane.xlu0 %1101 }
 0xccf   :  { %3980 = vrcp.f32 %v1102_v38 }
 0xcd2   :  { %v1105_v39 = vpop.xlane.xlu0 %1104 }
 0xcd3   :  { %3982 = vrcp.f32 %v1105_v39 }
 0xcd6   :  { %v1200_v53 = vpop.permute.xlu0 %1199 }
 0xcd7   :  { %v1221_v3 = vsel %vm387_vm4, %v4516_v51, %v1200_v53  ;;  %v3185_v51 = vld [vmem:[%s4976_s11] ss:$0 sm:$0xff] }
 0xcd8   :  { %v1223_v59 = vsel %vm475_vm6, %v1221_v3, %v1208_v55  ;;  %v1472_v53 = vld [vmem:[%s4981_s16 + $0x20] sm:$0xff]  ;;  %v1474_v55 = vld [vmem:[%s4981_s16 + $0x30] sm:$0xff]  ;;  %v1475_v3 = vld [vmem:[%s4981_s16 + $0x38] sm:$0xff] }
 0xcd9   :  { %v3981_v40 = vpop.eup %3980 }
 0xcda   :  { %v1107_v41 = vmul.f32 %v3981_v40, %v3977_v6  ;;  %v1210_v5 = vpop.permute.xlu0 %1209 }
 0xcdb   :  { %v1224_v60 = vsel %vm475_vm6, %v1222_v57, %v1210_v5  ;;  %v3743_v5 = vpack.c.bf16 %v1473_v54, %v1472_v53  ;;  %v3190_v57 = vld [vmem:[%s4980_s15] ss:$0 sm:$0xff] }
 0xcdc   :  { %3492 = vmatprep.mubr.msk.f32.mxu0 %vm475_vm6, %v1107_v41  ;;  %v3189_v41 = vld [vmem:[%s4978_s13] ss:$0 sm:$0xff] }
 0xcdd   :  { %v3983_v42 = vpop.eup %3982 }
 0xcde   :  { %v1109_v43 = vmul.f32 %v3983_v42, %v3979_v36 }
 0xce0   :  { %3493 = vmatmul.mubr.msk.f32.vlgmr.msra.gmra.mrb[6].mxu0 %vm475_vm6, %v1109_v43 }
 0xce1   :  { %3722 = vmatpush3.bf16.msra.mxu0 %v3719_v46  ;;  %v1469_v46 = vld [vmem:[%s4981_s16 + $0x8] sm:$0xff] }
 0xce2   :  { %3724 = vmatprep.subr.bf16.mxu0 %v3723_v48  ;;  %v3735_v47 = vpack.c.bf16 %v1469_v46, %v1468_v45  ;;  %v3196_v45 = vld [vmem:[%s4983_s18] ss:$0 sm:$0xff] }
 0xce5   :  { %3726 = vmatpush3.bf16.msra.mxu0 %v3723_v48  ;;  %v1470_v48 = vld [vmem:[%s4981_s16 + $0x10] sm:$0xff] }
 0xce6   :  { %3736 = vmatprep.subr.bf16.mxu0 %v3735_v47 }
 0xdb3   :  { %v3494_v49 = vpop.f32.mrb[6].mxu0 }
 0xdb4   :  { %1217 = vrot.lane.b32.xlu0 %v3494_v49, %s5005_s3  ;;  %v1188_v52 = vpop.f32.mrb[7].mxu0  ;;  %v1471_v49 = vld [vmem:[%s4981_s16 + $0x18] sm:$0xff] }
 0xdb5   :  { %1215 = vrot.lane.b32.xlu1 %v1188_v52, %s5005_s3  ;;  %v3739_v52 = vpack.c.bf16 %v1471_v49, %v1470_v48  ;;  %v3197_v49 = vld [vmem:[%s4984_s19] ss:$0 sm:$0xff] }
 0xe26   :  { %v1218_v56 = vpop.permute.xlu0 %1217 }
 0xe27   :  { %v1216_v58 = vpop.permute.xlu1 %1215  ;;  %v1227_v63 = vsel %vm1225_vm7, %v1224_v60, %v1218_v56  ;;  %v3747_v56 = vpack.c.bf16 %v1475_v3, %v1474_v55  ;;  %v3203_v55 = vld [vmem:[%s4974_s9 + $0x1] ss:$0 sm:$0xff]  ;;  %s5027_s9 = smov 40  }
 0xe28   :  { %v1226_v61 = vsel %vm1225_vm7, %v1223_v59, %v1216_v58 }
 0xe29   :  { %3503 = vmatprep.mubr.msk.f32.mxu0 %vm243_vm3, %v1226_v61 }
 0xe2a   :  { %3504 = vmatmul.mubr.msk.f32.vlgmr.msra.gmra.mrb[8].mxu0 %vm243_vm3, %v1227_v63 }
 0xe2b   :  { %3738 = vmatpush3.bf16.msra.mxu0 %v3735_v47 }
 0xe2c   :  { %3740 = vmatprep.subr.bf16.mxu0 %v3739_v52 }
 0xe2f   :  { %3742 = vmatpush3.bf16.msra.mxu0 %v3739_v52 }
 0xe30   :  { %3744 = vmatprep.subr.bf16.mxu0 %v3743_v5 }
 0xe33   :  { %3746 = vmatpush3.bf16.msra.mxu0 %v3743_v5 }
 0xe34   :  { %3748 = vmatprep.subr.bf16.mxu0 %v3747_v56 }
 0xe37   :  { %3750 = vmatpush3.bf16.msra.mxu0 %v3747_v56 }
 0xefd   :  { %v3505_v1 = vpop.f32.mrb[8].mxu0 }
 0xefe   :  { %v1317_v2 = vadd.f32 %v3505_v1, %v3185_v51  ;;  %v1311_v50 = vpop.f32.mrb[9].mxu0 }
 0xeff   :  { %v1312_v4 = vadd.f32 %v3185_v51, %v1311_v50 }
 0xf00   :  { %v1321_v7 = vadd.f32 %v1317_v2, %v4457_v0 }
 0xf01   :  { %v1320_v8 = vadd.f32 %v1312_v4, %v4453_v62  ;;  %v1366_v62 = vld [vmem:[%s4979_s14] sm:$0xff] }
 0xf02   :  { %v1327_v9 = vsel %vm243_vm3, %v1321_v7, 0.0  ;;  %v3727_v26 = vpack.c.bf16 %v1367_v25, %v1366_v62 }
 0xf03   :  { %1328 = vadd.xlane.f32.xlu0 %v1327_v9  ;;  %v1324_v11 = vsel %vm243_vm3, %v1320_v8, 0.0 }
 0xf04   :  { %1325 = vadd.xlane.f32.xlu1 %v1324_v11  ;;  %3728 = vmatprep.subr.bf16.mxu1 %v3727_v26 }
 0xf05   :  { %3730 = vmatpush3.bf16.msra.mxu1 %v3727_v26 }
 0xf06   :  { %3732 = vmatprep.subr.bf16.mxu1 %v3731_v29 }
 0xf09   :  { %3734 = vmatpush3.bf16.msra.mxu1 %v3731_v29 }
 0xf90   :  { %v1329_v12 = vpop.xlane.xlu0 %1328 }
 0xf91   :  { %v1331_v14 = vmul.f32 0.03125, %v1329_v12  ;;  %v1326_v15 = vpop.xlane.xlu1 %1325  ;;  %v3193_v12 = vld [vmem:[%s4982_s17] ss:$0 sm:$0xff] }
 0xf92   :  { %v1330_v19 = vmul.f32 0.03125, %v1326_v15 }
 0xf93   :  { %v1333_v20 = vsub.f32 %v1321_v7, %v1331_v14 }
 0xf94   :  { %v1332_v21 = vsub.f32 %v1320_v8, %v1330_v19 }
 0xf95   :  { %v1335_v22 = vmul.f32 %v1333_v20, %v1333_v20 }
 0xf96   :  { %v1334_v23 = vmul.f32 %v1332_v21, %v1332_v21 }
 0xf97   :  { %v1339_v24 = vsel %vm243_vm3, %v1335_v22, 0.0 }
 0xf98   :  { %1340 = vadd.xlane.f32.xlu1 %v1339_v24  ;;  %v1336_v0 = vsel %vm243_vm3, %v1334_v23, 0.0 }
 0xf99   :  { %1337 = vadd.xlane.f32.xlu0 %v1336_v0 }
0x1025   :  { %v1341_v30 = vpop.xlane.xlu1 %1340 }
0x1026   :  { %v1343_v31 = vmul.f32 0.03125, %v1341_v30  ;;  %v1338_v34 = vpop.xlane.xlu0 %1337 }
0x1027   :  { %v1342_v35 = vmul.f32 0.03125, %v1338_v34 }
0x1028   :  { %v1345_v6 = vadd.f32 1e-12, %v1343_v31 }
0x1029   :  { %v1344_v32 = vadd.f32 1e-12, %v1342_v35  ;;  %v3198_v35 = vld [vmem:[%s4973_s8 + $0x20] sm:$0xff] }
0x102a   :  { %3984 = vrsqrt.f32 %v1345_v6  ;;  %v3199_v6 = vld [vmem:[%s4973_s8 + $0x28] sm:$0xff] }
0x102b   :  { %3986 = vrsqrt.f32 %v1344_v32  ;;  %v3751_v32 = vpack.c.bf16 %v3199_v6, %v3198_v35 }
0x102d   :  { %3752 = vmatprep.subr.bf16.mxu1 %v3751_v32 }
0x1034   :  { %v3985_v36 = vpop.eup %3984 }
0x1035   :  { %v3987_v38 = vpop.eup %3986  ;;  %v1349_v39 = vmul.f32 %v3985_v36, %v1333_v20  ;;  %v3200_v36 = vld [vmem:[%s4973_s8 + $0x30] sm:$0xff] }
0x1036   :  { %v1348_v40 = vmul.f32 %v3987_v38, %v1332_v21 }
0x1037   :  { %v1357_v42 = vmul.f32 %v3188_v37, %v1349_v39 }
0x1038   :  { %v1356_v43 = vmul.f32 %v3188_v37, %v1348_v40  ;;  %v3201_v37 = vld [vmem:[%s4973_s8 + $0x38] sm:$0xff] }
0x1039   :  { %v1365_v33 = vadd.f32 %v3189_v41, %v1357_v42  ;;  %v3755_v38 = vpack.c.bf16 %v3201_v37, %v3200_v36 }
0x103a   :  { %v1364_v44 = vadd.f32 %v3189_v41, %v1356_v43 }
0x103c   :  { %3514 = vmatprep.mubr.msk.f32.mxu1 %vm243_vm3, %v1364_v44 }
0x103d   :  { %3515 = vmatmul.mubr.msk.f32.vlgmr.msra.gmra.mrb[12].mxu1 %vm243_vm3, %v1365_v33 }
0x103e   :  { %3754 = vmatpush3.bf16.msra.mxu1 %v3751_v32 }
0x103f   :  { %3756 = vmatprep.subr.bf16.mxu1 %v3755_v38 }
0x1042   :  { %3758 = vmatpush3.bf16.msra.mxu1 %v3755_v38 }
0x1110   :  { %v3516_v58 = vpop.f32.mrb[12].mxu1 }
0x1111   :  { %v1455_v59 = vadd.f32 %v3516_v58, %v3190_v57  ;;  %v1449_v60 = vpop.f32.mrb[13].mxu1 }
0x1112   :  { %v1450_v61 = vadd.f32 %v3190_v57, %v1449_v60 }
0x1113   :  { %v1461_v63 = vmul.f32 0.70710677, %v1455_v59  ;;  %v1459_v8 = vmul.f32 0.5, %v1455_v59 }
0x1114   :  { %v1460_v51 = vmul.f32 0.70710677, %v1450_v61  ;;  %v1458_v4 = vmul.f32 0.5, %v1450_v61 }
0x1115   :  { %3988 = verf.f32 %v1461_v63 }
0x1116   :  { %3990 = verf.f32 %v1460_v51 }
0x111f   :  { %v3989_v1 = vpop.eup %3988 }
0x1120   :  { %v3991_v2 = vpop.eup %3990  ;;  %v1465_v50 = vadd.f32 1.0, %v3989_v1 }
0x1121   :  { %v1464_v7 = vadd.f32 1.0, %v3991_v2 }
0x1122   :  { %v1467_v11 = vmul.f32 %v1465_v50, %v1459_v8 }
0x1123   :  { %v1466_v9 = vmul.f32 %v1464_v7, %v1458_v4 }
0x1125   :  { %3533 = vmatprep.mubr.msk.f32.mxu0 %vm150_vm0, %v1466_v9 }
0x1126   :  { %3534 = vmatmul.mubr.msk.f32.vlgmr.msra.gmra.mrb[10].mxu0 %vm150_vm0, %v1467_v11 }
0x11f9   :  { %v3535_v14 = vpop.f32.mrb[10].mxu0 }
0x11fa   :  { %v1561_v15 = vadd.f32 %v3535_v14, %v3193_v12  ;;  %v1555_v19 = vpop.f32.mrb[11].mxu0 }
0x11fb   :  { %v1556_v20 = vadd.f32 %v3193_v12, %v1555_v19 }
0x11fc   :  { %v1565_v21 = vadd.f32 %v1561_v15, %v1365_v33 }
0x11fd   :  { %v1564_v22 = vadd.f32 %v1556_v20, %v1364_v44 }
0x11fe   :  { %v1571_v23 = vsel %vm243_vm3, %v1565_v21, 0.0 }
0x11ff   :  { %1572 = vadd.xlane.f32.xlu1 %v1571_v23  ;;  %v1568_v24 = vsel %vm243_vm3, %v1564_v22, 0.0 }
0x1200   :  { %1569 = vadd.xlane.f32.xlu0 %v1568_v24 }
0x128c   :  { %v1573_v0 = vpop.xlane.xlu1 %1572 }
0x128d   :  { %v1575_v62 = vmul.f32 0.03125, %v1573_v0  ;;  %v1570_v25 = vpop.xlane.xlu0 %1569 }
0x128e   :  { %v1574_v26 = vmul.f32 0.03125, %v1570_v25 }
0x128f   :  { %v1577_v27 = vsub.f32 %v1565_v21, %v1575_v62 }
0x1290   :  { %v1576_v28 = vsub.f32 %v1564_v22, %v1574_v26 }
0x1291   :  { %v1579_v29 = vmul.f32 %v1577_v27, %v1577_v27 }
0x1292   :  { %v1578_v30 = vmul.f32 %v1576_v28, %v1576_v28 }
0x1293   :  { %v1583_v31 = vsel %vm243_vm3, %v1579_v29, 0.0 }
0x1294   :  { %1584 = vadd.xlane.f32.xlu1 %v1583_v31  ;;  %v1580_v34 = vsel %vm243_vm3, %v1578_v30, 0.0 }
0x1295   :  { %1581 = vadd.xlane.f32.xlu0 %v1580_v34 }
0x1321   :  { %v1585_v39 = vpop.xlane.xlu1 %1584 }
0x1322   :  { %v1587_v40 = vmul.f32 0.03125, %v1585_v39  ;;  %v1582_v41 = vpop.xlane.xlu0 %1581 }
0x1323   :  { %v1586_v42 = vmul.f32 0.03125, %v1582_v41 }
0x1324   :  { %v1589_v43 = vadd.f32 1e-12, %v1587_v40 }
0x1325   :  { %v1588_v44 = vadd.f32 1e-12, %v1586_v42 }
0x1326   :  { %3992 = vrsqrt.f32 %v1589_v43 }
0x1327   :  { %3994 = vrsqrt.f32 %v1588_v44 }
0x1330   :  { %v3993_v33 = vpop.eup %3992 }
0x1331   :  { %v3995_v46 = vpop.eup %3994  ;;  %v1593_v47 = vmul.f32 %v3993_v33, %v1577_v27 }
0x1332   :  { %v1592_v48 = vmul.f32 %v3995_v46, %v1576_v28 }
0x1333   :  { %v1601_v52 = vmul.f32 %v3196_v45, %v1593_v47 }
0x1334   :  { %v1600_v53 = vmul.f32 %v3196_v45, %v1592_v48 }
0x1335   :  { %v4691_v5 = vadd.f32 %v3197_v49, %v1601_v52 }
0x1336   :  { %v4689_v54 = vadd.f32 %v3197_v49, %v1600_v53 }
0x1338   :  { %3544 = vmatprep.mubr.msk.f32.mxu1 %vm243_vm3, %v4689_v54 }
0x1339   :  { %3545 = vmatmul.mubr.msk.f32.vlgmr.msra.gmra.mrb[14].mxu1 %vm243_vm3, %v4691_v5 }
0x140c   :  { %v3546_v3 = vpop.f32.mrb[14].mxu1 }
0x140d   :  { %v4700_v56 = vadd.f32 %v3546_v3, %v3203_v55  ;;  %v1695_v57 = vpop.f32.mrb[15].mxu1 }
0x140e   :  { %v4702_v58 = vadd.f32 %v3203_v55, %v1695_v57 }
0x1410   :  { %3551 = vmatprep.mubr.msk.f32.mxu1 %vm387_vm4, %v4702_v58  ;;  %v4708_v59 = vpack.i.bf16 %v4700_v56, %v4702_v58 }
0x1412   :  { %3913 = vrot.lane.b32.xlu1 %v4708_v59, %s4201_s27  ;;  %3908 = vrot.lane.b32.xlu0 %v4708_v59, %s4200_s21  ;;  %s5028_s21 = smov 8   ;;  %s5029_s27 = smov 16  }
0x1416   :  { %1906 = vrot.lane.b32.xlu1 %v4702_v58, %s4203_s5  ;;  %1908 = vrot.lane.b32.xlu0 %v4700_v56, %s4203_s5 }
0x1484   :  { %v3914_v60 = vpop.permute.xlu1 %3913  ;;  %v3909_v61 = vpop.permute.xlu0 %3908 }
0x1485   :  { %v3916_v63 = vunpack.i.h.bf16 %v3914_v60  ;;  %v3915_v51 = vunpack.i.l.bf16 %v3914_v60  ;;  %v3911_v1 = vunpack.i.h.bf16 %v3909_v61  ;;  %v3910_v2 = vunpack.i.l.bf16 %v3909_v61 }
0x1487   :  { %v3759_v50 = vpack.c.bf16 %v3911_v1, %v3910_v2  ;;  %v3769_v4 = vpack.c.bf16 %v3916_v63, %v3915_v51 }
0x1488   :  { %v1907_v7 = vpop.permute.xlu1 %1906  ;;  %v1909_v8 = vpop.permute.xlu0 %1908 }
0x1489   :  { %3761 = vmatprep.subr.msk.bf16.mxu1 %vm4478_vm5, %v3759_v50 }
0x148a   :  { %3764 = vmatpush3.bf16.xpose.msk.msra.mxu1 %vm4478_vm5, %v3759_v50 }
0x148b   :  { %3771 = vmatprep.subr.msk.bf16.mxu1 %vm4478_vm5, %v3769_v4 }
0x1491   :  { %3552 = vmatmul.mubr.msk.f32.vlgmr.msra.gmra.mrb[16].mxu1 %vm387_vm4, %v4700_v56 }
0x1492   :  { %3774 = vmatpush3.bf16.xpose.msk.msra.mxu1 %vm4478_vm5, %v3769_v4  ;;  %3565 = vmatprep.mubr.msk.f32.mxu1 %vm387_vm4, %v1907_v7 }
0x1499   :  { %3566 = vmatmul.mubr.msk.f32.vlgmr.msra.gmra.mrb[18].mxu1 %vm387_vm4, %v1909_v8 }
0x1564   :  { %v3553_v9 = vpop.f32.mrb[16].mxu1 }
0x1565   :  { %v1794_v11 = vmul.f32 0.35355338, %v3553_v9  ;;  %v1784_v12 = vpop.f32.mrb[17].mxu1 }
0x1566   :  { %v1793_v14 = vmul.f32 0.35355338, %v1784_v12 }
0x1567   :  { %v1796_v15 = vadd.f32 %v1794_v11, %v4488_v13 }
0x1568   :  { %v1795_v19 = vadd.f32 %v1793_v14, %v4490_v17 }
0x1569   :  { %v1800_v20 = vsel %vm475_vm6, %v1796_v15, -inf }
0x156a   :  { %1801 = vmax.xlane.f32.xlu0 %v1800_v20  ;;  %v1797_v21 = vsel %vm475_vm6, %v1795_v19, -inf }
0x156b   :  { %1798 = vmax.xlane.f32.xlu1 %v1797_v21 }
0x156c   :  { %v3567_v22 = vpop.f32.mrb[18].mxu1 }
0x156d   :  { %v1998_v23 = vmul.f32 0.35355338, %v3567_v22  ;;  %v1988_v24 = vpop.f32.mrb[19].mxu1 }
0x156e   :  { %v1997_v0 = vmul.f32 0.35355338, %v1988_v24 }
0x156f   :  { %v2000_v62 = vadd.f32 %v1998_v23, %v4488_v13 }
0x1570   :  { %v1999_v25 = vadd.f32 %v1997_v0, %v4490_v17 }
0x1571   :  { %v2004_v26 = vsel %vm475_vm6, %v2000_v62, -inf }
0x1572   :  { %2005 = vmax.xlane.f32.xlu1 %v2004_v26  ;;  %v2001_v27 = vsel %vm475_vm6, %v1999_v25, -inf  ;;  %v4048_v26 = vld [vmem:[#allocation2 + $0x8] sm:$0xff] }
0x1573   :  { %2002 = vmax.xlane.f32.xlu0 %v2001_v27 }
0x15f7   :  { %v1802_v28 = vpop.xlane.xlu0 %1801 }
0x15f8   :  { %v1804_v29 = vsub.f32 %v1796_v15, %v1802_v28  ;;  %v1799_v30 = vpop.xlane.xlu1 %1798  ;;  %v4049_v28 = vld [vmem:[#allocation2] sm:$0xff] }
0x15f9   :  { %v1803_v31 = vsub.f32 %v1795_v19, %v1799_v30 }
0x15fa   :  { %v1807_v34 = vmul.f32 1.442695, %v1804_v29 }
0x15fb   :  { %v1805_v35 = vmul.f32 1.442695, %v1803_v31 }
0x15fc   :  { %3996 = vpow2.f32 %v1807_v34 }
0x15fd   :  { %3998 = vpow2.f32 %v1805_v35 }
0x15ff   :  { %v2006_v6 = vpop.xlane.xlu1 %2005 }
0x1600   :  { %v2008_v32 = vsub.f32 %v2000_v62, %v2006_v6  ;;  %v2003_v36 = vpop.xlane.xlu0 %2002 }
0x1601   :  { %v2007_v13 = vsub.f32 %v1999_v25, %v2003_v36 }
0x1602   :  { %v2011_v37 = vmul.f32 1.442695, %v2008_v32 }
0x1603   :  { %v2009_v17 = vmul.f32 1.442695, %v2007_v13 }
0x1604   :  { %4000 = vpow2.f32 %v2011_v37 }
0x1605   :  { %4002 = vpow2.f32 %v2009_v17 }
0x1606   :  { %v3997_v38 = vpop.eup %3996 }
0x1607   :  { %v3999_v39 = vpop.eup %3998  ;;  %v1812_v40 = vsel %vm475_vm6, %v3997_v38, 0.0 }
0x1608   :  { %1813 = vadd.xlane.f32.xlu1 %v1812_v40  ;;  %v1809_v41 = vsel %vm475_vm6, %v3999_v39, 0.0 }
0x1609   :  { %1810 = vadd.xlane.f32.xlu0 %v1809_v41 }
0x160e   :  { %v4001_v42 = vpop.eup %4000 }
0x160f   :  { %v4003_v43 = vpop.eup %4002  ;;  %v2016_v44 = vsel %vm475_vm6, %v4001_v42, 0.0 }
0x1610   :  { %2017 = vadd.xlane.f32.xlu1 %v2016_v44  ;;  %v2013_v33 = vsel %vm475_vm6, %v4003_v43, 0.0 }
0x1611   :  { %2014 = vadd.xlane.f32.xlu0 %v2013_v33 }
0x1621   :  { %3923 = vrot.lane.b32.xlu1 %v4708_v59, %s4204_s22 }
0x1625   :  { %3928 = vrot.lane.b32.xlu1 %v4708_v59, %s4206_s28 }
0x1627   :  { %3918 = vrot.lane.b32.xlu0 %v4708_v59, %s4202_s6 }
0x1629   :  { %2112 = vrot.lane.b32.xlu1 %v4700_v56, %s4205_s2 }
0x162b   :  { %2110 = vrot.lane.b32.xlu0 %v4702_v58, %s4205_s2 }
0x1695   :  { %v1814_v46 = vpop.xlane.xlu1 %1813 }
0x1696   :  { %v1811_v45 = vpop.xlane.xlu0 %1810 }
0x1697   :  { %4004 = vrcp.f32 %v1811_v45 }
0x1698   :  { %4006 = vrcp.f32 %v1814_v46 }
0x169d   :  { %v2018_v47 = vpop.xlane.xlu1 %2017 }
0x169e   :  { %v2015_v48 = vpop.xlane.xlu0 %2014 }
0x169f   :  { %4008 = vrcp.f32 %v2015_v48 }
0x16a0   :  { %4010 = vrcp.f32 %v2018_v47 }
0x16a1   :  { %v4005_v49 = vpop.eup %4004  ;;  %v3924_v52 = vpop.permute.xlu1 %3923 }
0x16a2   :  { %v3919_v53 = vpop.permute.xlu0 %3918  ;;  %v1816_v55 = vmul.f32 %v4005_v49, %v3999_v39  ;;  %v3926_v3 = vunpack.i.h.bf16 %v3924_v52  ;;  %v3925_v57 = vunpack.i.l.bf16 %v3924_v52  ;;  %v4007_v1 = vpop.eup %4006 }
0x16a3   :  { %v3921_v60 = vunpack.i.h.bf16 %v3919_v53  ;;  %v3920_v61 = vunpack.i.l.bf16 %v3919_v53  ;;  %v1818_v8 = vmul.f32 %v4007_v1, %v3997_v38 }
0x16a4   :  { %3558 = vmatprep.mubr.msk.f32.mxu0 %vm475_vm6, %v1816_v55  ;;  %v3775_v2 = vpack.c.bf16 %v3926_v3, %v3925_v57 }
0x16a5   :  { %v3765_v63 = vpack.c.bf16 %v3921_v60, %v3920_v61  ;;  %v3929_v51 = vpop.permute.xlu1 %3928 }
0x16a6   :  { %v3931_v50 = vunpack.i.h.bf16 %v3929_v51  ;;  %v3930_v4 = vunpack.i.l.bf16 %v3929_v51  ;;  %v2111_v15 = vpop.permute.xlu0 %2110 }
0x16a7   :  { %3766 = vmatprep.subr.bf16.mxu0 %v3765_v63 }
0x16a8   :  { %3768 = vmatpush3.bf16.msra.mxu0 %v3765_v63  ;;  %v3779_v12 = vpack.c.bf16 %v3931_v50, %v3930_v4 }
0x16a9   :  { %v4009_v7 = vpop.eup %4008  ;;  %3776 = vmatprep.subr.bf16.mxu0 %v3775_v2  ;;  %v2113_v19 = vpop.permute.xlu1 %2112 }
0x16aa   :  { %v4011_v9 = vpop.eup %4010  ;;  %v2020_v11 = vmul.f32 %v4009_v7, %v4003_v43 }
0x16ab   :  { %3559 = vmatmul.mubr.msk.f32.vlgmr.msra.gmra.mrb[12].mxu0 %vm475_vm6, %v1818_v8  ;;  %v2022_v14 = vmul.f32 %v4011_v9, %v4001_v42 }
0x16ac   :  { %3778 = vmatpush3.bf16.msra.mxu0 %v3775_v2  ;;  %3572 = vmatprep.mubr.msk.f32.mxu0 %vm475_vm6, %v2020_v11 }
0x16ad   :  { %3781 = vmatprep.subr.msk.bf16.mxu0 %vm4478_vm5, %v3779_v12 }
0x16af   :  { %3573 = vmatmul.mubr.msk.f32.vlgmr.msra.gmra.mrb[14].mxu0 %vm475_vm6, %v2022_v14 }
0x16b0   :  { %3579 = vmatprep.mubr.msk.f32.mxu0 %vm387_vm4, %v2111_v15 }
0x16b5   :  { %3784 = vmatpush3.bf16.xpose.msk.msra.mxu0 %vm4478_vm5, %v3779_v12 }
0x16bc   :  { %3580 = vmatmul.mubr.msk.f32.vlgmr.msra.gmra.mrb[16].mxu0 %vm387_vm4, %v2113_v19 }
0x177e   :  { %v4762_v20 = vpop.f32.mrb[12].mxu0 }
0x177f   :  { %v4764_v21 = vpop.f32.mrb[13].mxu0 }
0x1782   :  { %v4766_v22 = vpop.f32.mrb[14].mxu0 }
0x1783   :  { %v4768_v23 = vpop.f32.mrb[15].mxu0 }
0x178f   :  { %v3581_v24 = vpop.f32.mrb[16].mxu0 }
0x1790   :  { %v2202_v0 = vmul.f32 0.35355338, %v3581_v24  ;;  %v2192_v62 = vpop.f32.mrb[17].mxu0 }
0x1791   :  { %v2201_v25 = vmul.f32 0.35355338, %v2192_v62 }
0x1792   :  { %v2204_v27 = vadd.f32 %v4048_v26, %v2202_v0 }
0x1793   :  { %v2203_v29 = vadd.f32 %v4049_v28, %v2201_v25 }
0x1794   :  { %v2208_v30 = vsel %vm475_vm6, %v2204_v27, -inf }
0x1795   :  { %2209 = vmax.xlane.f32.xlu1 %v2208_v30  ;;  %v2205_v31 = vsel %vm475_vm6, %v2203_v29, -inf }
0x1796   :  { %2206 = vmax.xlane.f32.xlu0 %v2205_v31  ;;  %v3230_v31 = vld [vmem:[%s4975_s10 + $0x20] sm:$0xff] }
0x17a6   :  { %3933 = vrot.lane.b32.xlu1 %v4708_v59, %s4207_s29  ;;  %s5031_s29 = sld [smem:[#allocation26_spill]] }
0x17aa   :  { %2314 = vrot.lane.b32.xlu1 %v4702_v58, %s4208_s25 }
0x17ae   :  { %2316 = vrot.lane.b32.xlu1 %v4700_v56, %s4208_s25  ;;  %s5032_s25 = sld [smem:[#allocation20_spill]] }
0x1822   :  { %v2210_v34 = vpop.xlane.xlu1 %2209 }
0x1823   :  { %v2212_v35 = vsub.f32 %v2204_v27, %v2210_v34  ;;  %v2207_v6 = vpop.xlane.xlu0 %2206  ;;  %v3232_v34 = vld [vmem:[%s4975_s10 + $0x30] sm:$0xff] }
0x1824   :  { %v2211_v32 = vsub.f32 %v2203_v29, %v2207_v6  ;;  %v3233_v6 = vld [vmem:[%s4975_s10 + $0x38] sm:$0xff] }
0x1825   :  { %v2215_v36 = vmul.f32 1.442695, %v2212_v35 }
0x1826   :  { %v2213_v13 = vmul.f32 1.442695, %v2211_v32  ;;  %v3934_v37 = vpop.permute.xlu1 %3933  ;;  %v3803_v32 = vpack.c.bf16 %v3233_v6, %v3232_v34  ;;  %v3252_v34 = vld [vmem:[%s4981_s16 + $0x50] sm:$0xff] }
0x1827   :  { %4012 = vpow2.f32 %v2215_v36  ;;  %v3936_v17 = vunpack.i.h.bf16 %v3934_v37  ;;  %v3935_v38 = vunpack.i.l.bf16 %v3934_v37 }
0x1828   :  { %4014 = vpow2.f32 %v2213_v13 }
0x1829   :  { %v3785_v39 = vpack.c.bf16 %v3936_v17, %v3935_v38 }
0x182a   :  { %v2315_v53 = vpop.permute.xlu1 %2314 }
0x182b   :  { %3786 = vmatprep.subr.bf16.mxu1 %v3785_v39 }
0x182c   :  { %3788 = vmatpush3.bf16.msra.mxu1 %v3785_v39 }
0x182e   :  { %v2317_v55 = vpop.permute.xlu1 %2316 }
0x1831   :  { %v4013_v40 = vpop.eup %4012 }
0x1832   :  { %v2220_v58 = vsel %vm475_vm6, %v4013_v40, 0.0  ;;  %v4015_v41 = vpop.eup %4014 }
0x1833   :  { %2221 = vadd.xlane.f32.xlu0 %v2220_v58  ;;  %v2217_v56 = vsel %vm475_vm6, %v4015_v41, 0.0 }
0x1837   :  { %2218 = vadd.xlane.f32.xlu0 %v2217_v56 }
0x184d   :  { %3938 = vrot.lane.b32.xlu0 %v4708_v59, %s4209_s24 }
0x18c0   :  { %v2222_v42 = vpop.xlane.xlu0 %2221 }
0x18c1   :  { %4016 = vrcp.f32 %v2222_v42 }
0x18c4   :  { %v2219_v43 = vpop.xlane.xlu0 %2218 }
0x18c5   :  { %4018 = vrcp.f32 %v2219_v43 }
0x18c8   :  { %v3939_v44 = vpop.permute.xlu0 %3938 }
0x18c9   :  { %v3941_v33 = vunpack.i.h.bf16 %v3939_v44  ;;  %v3940_v45 = vunpack.i.l.bf16 %v3939_v44 }
0x18cb   :  { %v3789_v46 = vpack.c.bf16 %v3941_v33, %v3940_v45  ;;  %v4017_v47 = vpop.eup %4016 }
0x18cc   :  { %v2226_v52 = vmul.f32 %v4017_v47, %v4013_v40 }
0x18cd   :  { %3791 = vmatprep.subr.msk.bf16.mxu1 %vm4478_vm5, %v3789_v46 }
0x18cf   :  { %v4019_v48 = vpop.eup %4018 }
0x18d0   :  { %v2224_v49 = vmul.f32 %v4019_v48, %v4015_v41 }
0x18d2   :  { %3586 = vmatprep.mubr.msk.f32.mxu1 %vm475_vm6, %v2224_v49 }
0x18d3   :  { %3587 = vmatmul.mubr.msk.f32.vlgmr.msra.gmra.mrb[20].mxu1 %vm475_vm6, %v2226_v52 }
0x18d4   :  { %3794 = vmatpush3.bf16.xpose.msk.msra.mxu1 %vm4478_vm5, %v3789_v46  ;;  %3593 = vmatprep.mubr.msk.f32.mxu1 %vm387_vm4, %v2315_v53 }
0x18db   :  { %3594 = vmatmul.mubr.msk.f32.vlgmr.msra.gmra.mrb[22].mxu1 %vm387_vm4, %v2317_v55 }
0x19a6   :  { %v3588_v3 = vpop.f32.mrb[20].mxu1 }
0x19a7   :  { %v2305_v57 = vpop.f32.mrb[21].mxu1 }
0x19ae   :  { %v3595_v60 = vpop.f32.mrb[22].mxu1 }
0x19af   :  { %v2406_v61 = vmul.f32 0.35355338, %v3595_v60  ;;  %v2396_v63 = vpop.f32.mrb[23].mxu1 }
0x19b0   :  { %v2405_v51 = vmul.f32 0.35355338, %v2396_v63 }
0x19b1   :  { %v2408_v1 = vadd.f32 %v4048_v26, %v2406_v61 }
0x19b2   :  { %v2407_v2 = vadd.f32 %v4049_v28, %v2405_v51 }
0x19b3   :  { %v2412_v50 = vsel %vm475_vm6, %v2408_v1, -inf }
0x19b4   :  { %2413 = vmax.xlane.f32.xlu1 %v2412_v50  ;;  %v2409_v4 = vsel %vm475_vm6, %v2407_v2, -inf  ;;  %v3243_v50 = vld [vmem:[%s4979_s14 + $0x28] sm:$0xff] }
0x19b5   :  { %2410 = vmax.xlane.f32.xlu0 %v2409_v4 }
0x19c5   :  { %3943 = vrot.lane.b32.xlu1 %v4708_v59, %s5027_s9 }
0x19c9   :  { %2522 = vrot.lane.b32.xlu1 %v4766_v22, %s5028_s21 }
0x19cd   :  { %2528 = vrot.lane.b32.xlu1 %v2305_v57, %s5029_s27 }
0x1a41   :  { %v2414_v10 = vpop.xlane.xlu1 %2413 }
0x1a42   :  { %v2416_v7 = vsub.f32 %v2408_v1, %v2414_v10  ;;  %v2411_v8 = vpop.xlane.xlu0 %2410  ;;  %v3244_v10 = vld [vmem:[%s4979_s14 + $0x30] sm:$0xff] }
0x1a43   :  { %v2415_v9 = vsub.f32 %v2407_v2, %v2411_v8 }
0x1a44   :  { %v2419_v11 = vmul.f32 1.442695, %v2416_v7  ;;  %v3245_v7 = vld [vmem:[%s4979_s14 + $0x38] sm:$0xff] }
0x1a45   :  { %v2417_v12 = vmul.f32 1.442695, %v2415_v9  ;;  %v3944_v14 = vpop.permute.xlu1 %3943  ;;  %v3811_v8 = vpack.c.bf16 %v3245_v7, %v3244_v10 }
0x1a46   :  { %v3946_v15 = vunpack.i.h.bf16 %v3944_v14  ;;  %v3945_v19 = vunpack.i.l.bf16 %v3944_v14 }
0x1a47   :  { %4020 = vpow2.f32 %v2417_v12 }
0x1a48   :  { %v3795_v24 = vpack.c.bf16 %v3946_v15, %v3945_v19  ;;  %4022 = vpow2.f32 %v2419_v11 }
0x1a49   :  { %v2523_v17 = vpop.permute.xlu1 %2522 }
0x1a4a   :  { %3796 = vmatprep.subr.bf16.mxu0 %v3795_v24  ;;  %v2543_v41 = vsel %vm387_vm4, %v4762_v20, %v2523_v17  ;;  %v3257_v17 = vld [vmem:[%s4981_s16 + $0x78] sm:$0xff] }
0x1a4b   :  { %3798 = vmatpush3.bf16.msra.mxu0 %v3795_v24 }
0x1a4d   :  { %v2529_v39 = vpop.permute.xlu1 %2528 }
0x1a51   :  { %v4021_v59 = vpop.eup %4020 }
0x1a52   :  { %v2421_v0 = vsel %vm475_vm6, %v4021_v59, 0.0  ;;  %v4023_v22 = vpop.eup %4022 }
0x1a53   :  { %2422 = vadd.xlane.f32.xlu0 %v2421_v0  ;;  %v2424_v62 = vsel %vm475_vm6, %v4023_v22, 0.0 }
0x1a57   :  { %2425 = vadd.xlane.f32.xlu0 %v2424_v62 }
0x1a6d   :  { %2520 = vrot.lane.b32.xlu0 %v4768_v23, %s5028_s21  ;;  %v3231_v23 = vld [vmem:[%s4975_s10 + $0x28] sm:$0xff]  ;;  %s4213_s10 = smov [#allocation10]  }
0x1a6e   :  { %v3799_v35 = vpack.c.bf16 %v3231_v23, %v3230_v31  ;;  %v3251_v31 = vld [vmem:[%s4981_s16 + $0x48] sm:$0xff]  ;;  %s3123_s30 = sshll.u32 %s4213_s10, 4  ;;  %s3124_s30 = int_to_ptr.vmem [resolvable:$true] %s3123_s30 }
0x1a6f   :  { %p4143_p5 = scmp.lt.s32.totalorder %s3124_s30, %s3124_s30 }
0x1a70   :  { %3800 = vmatprep.subr.bf16.mxu0 %v3799_v35 }
0x1a71   :  { %2530 = vrot.lane.b32.xlu0 %v3588_v3, %s5029_s27 }
0x1ae0   :  { %v2423_v25 = vpop.xlane.xlu0 %2422 }
0x1ae1   :  { %4024 = vrcp.f32 %v2423_v25  ;;  %v3241_v25 = vld [vmem:[%s4978_s13 + $0x1] ss:$0 sm:$0xff] }
0x1ae4   :  { %v2426_v26 = vpop.xlane.xlu0 %2425 }
0x1ae5   :  { %4026 = vrcp.f32 %v2426_v26 }
0x1ae8   :  { %v2521_v37 = vpop.permute.xlu0 %2520 }
0x1ae9   :  { %v2542_v40 = vsel %vm387_vm4, %v4764_v21, %v2521_v37  ;;  %v3235_v21 = vld [vmem:[%s4976_s11 + $0x1] ss:$0 sm:$0xff]  ;;  %v3256_v37 = vld [vmem:[%s4981_s16 + $0x70] sm:$0xff]  ;;  %s4138_s11 = scalar_lea.vmem %s3124_s30, 256 }
0x1aea   :  { %v2544_v42 = vsel %vm475_vm6, %v2542_v40, %v2529_v39  ;;  %v3247_v39 = vld [vmem:[%s4980_s15 + $0x1] ss:$0 sm:$0xff]  ;;  %p4139_p4 = scmp.ne.s32.totalorder %s3124_s30, %s4138_s11  ;;  %p4144_p6 = scmp.lt.s32.totalorder %s4138_s11, %s4138_s11 }
0x1aeb   :  { %v4025_v27 = vpop.eup %4024 }
0x1aec   :  { %v2428_v28 = vmul.f32 %v4025_v27, %v4021_v59  ;;  %v2531_v38 = vpop.permute.xlu0 %2530  ;;  %v3240_v59 = vld [vmem:[%s4977_s12 + $0x1] ss:$0 sm:$0xff]  ;;  %p4145_p7 = por %p4144_p6, %p4143_p5 }
0x1aed   :  { %v2545_v43 = vsel %vm475_vm6, %v2543_v41, %v2531_v38  ;;  %v3827_v38 = vpack.c.bf16 %v3257_v17, %v3256_v37 }
0x1aee   :  { %3600 = vmatprep.mubr.msk.f32.mxu0 %vm475_vm6, %v2428_v28  ;;  %p4146_p8 = pnand %p4145_p7, %p4139_p4 }
0x1aef   :  { %v4027_v29 = vpop.eup %4026 }
0x1af0   :  { %v2430_v30 = vmul.f32 %v4027_v29, %v4023_v22 }
0x1af2   :  { %3601 = vmatmul.mubr.msk.f32.vlgmr.msra.gmra.mrb[18].mxu0 %vm475_vm6, %v2430_v30  ;;  %v3250_v30 = vld [vmem:[%s4981_s16 + $0x40] sm:$0xff] }
0x1af3   :  { %3802 = vmatpush3.bf16.msra.mxu0 %v3799_v35  ;;  %v3815_v23 = vpack.c.bf16 %v3251_v31, %v3250_v30  ;;  %v3253_v35 = vld [vmem:[%s4981_s16 + $0x58] sm:$0xff]  ;;  %v3265_v31 = vld [vmem:[%s4984_s19 + $0x1] ss:$0 sm:$0xff] }
0x1af4   :  { %3804 = vmatprep.subr.bf16.mxu0 %v3803_v32  ;;  %v3819_v6 = vpack.c.bf16 %v3253_v35, %v3252_v34 }
0x1af7   :  { %3806 = vmatpush3.bf16.msra.mxu0 %v3803_v32  ;;  %v3254_v32 = vld [vmem:[%s4981_s16 + $0x60] sm:$0xff] }
0x1af8   :  { %3816 = vmatprep.subr.bf16.mxu0 %v3815_v23 }
0x1bc5   :  { %v3602_v36 = vpop.f32.mrb[18].mxu0 }
0x1bc6   :  { %2538 = vrot.lane.b32.xlu0 %v3602_v36, %s5030_s0  ;;  %v2509_v13 = vpop.f32.mrb[19].mxu0  ;;  %v3255_v36 = vld [vmem:[%s4981_s16 + $0x68] sm:$0xff] }
0x1bc7   :  { %2536 = vrot.lane.b32.xlu1 %v2509_v13, %s5030_s0  ;;  %v3823_v13 = vpack.c.bf16 %v3255_v36, %v3254_v32  ;;  %v3266_v32 = vld [vmem:[%s5031_s29] ss:$0 sm:$0xff] }
0x1c38   :  { %v2539_v58 = vpop.permute.xlu0 %2538 }
0x1c39   :  { %v2537_v56 = vpop.permute.xlu1 %2536  ;;  %v2547_v33 = vsel %vm1225_vm7, %v2545_v43, %v2539_v58 }
0x1c3a   :  { %v2546_v44 = vsel %vm1225_vm7, %v2544_v42, %v2537_v56 }
0x1c3b   :  { %3611 = vmatprep.mubr.msk.f32.mxu0 %vm243_vm3, %v2546_v44 }
0x1c3c   :  { %3612 = vmatmul.mubr.msk.f32.vlgmr.msra.gmra.mrb[20].mxu0 %vm243_vm3, %v2547_v33 }
0x1c3d   :  { %3818 = vmatpush3.bf16.msra.mxu0 %v3815_v23 }
0x1c3e   :  { %3820 = vmatprep.subr.bf16.mxu0 %v3819_v6 }
0x1c41   :  { %3822 = vmatpush3.bf16.msra.mxu0 %v3819_v6 }
0x1c42   :  { %3824 = vmatprep.subr.bf16.mxu0 %v3823_v13 }
0x1c45   :  { %3826 = vmatpush3.bf16.msra.mxu0 %v3823_v13 }
0x1c46   :  { %3828 = vmatprep.subr.bf16.mxu0 %v3827_v38 }
0x1c49   :  { %3830 = vmatpush3.bf16.msra.mxu0 %v3827_v38  ;;  %v3035_v38 = vld [vmem:[%s5032_s25 + $0x8] sm:$0xff] }
0x1c4a   :  { %vm3037_vm8 = vcmp.ne.s32.totalorder %v3035_v38, 4294967196 }
0x1d0f   :  { %v3613_v45 = vpop.f32.mrb[20].mxu0 }
0x1d10   :  { %v2639_v46 = vadd.f32 %v3613_v45, %v3235_v21  ;;  %v2633_v20 = vpop.f32.mrb[21].mxu0 }
0x1d11   :  { %v2634_v47 = vadd.f32 %v3235_v21, %v2633_v20 }
0x1d12   :  { %v2643_v48 = vadd.f32 %v2639_v46, %v4691_v5 }
0x1d13   :  { %v2642_v49 = vadd.f32 %v2634_v47, %v4689_v54  ;;  %v3242_v54 = vld [vmem:[%s4979_s14 + $0x20] sm:$0xff] }
0x1d14   :  { %v2651_v52 = vsel %vm243_vm3, %v2643_v48, 0.0  ;;  %v3807_v4 = vpack.c.bf16 %v3243_v50, %v3242_v54 }
0x1d15   :  { %2652 = vadd.xlane.f32.xlu0 %v2651_v52  ;;  %v2648_v53 = vsel %vm243_vm3, %v2642_v49, 0.0 }
0x1d16   :  { %2649 = vadd.xlane.f32.xlu1 %v2648_v53  ;;  %3808 = vmatprep.subr.bf16.mxu1 %v3807_v4 }
0x1d17   :  { %3810 = vmatpush3.bf16.msra.mxu1 %v3807_v4 }
0x1d18   :  { %3812 = vmatprep.subr.bf16.mxu1 %v3811_v8 }
0x1d1b   :  { %3814 = vmatpush3.bf16.msra.mxu1 %v3811_v8 }
0x1da2   :  { %v2653_v55 = vpop.xlane.xlu0 %2652 }
0x1da3   :  { %v2655_v3 = vmul.f32 0.03125, %v2653_v55  ;;  %v2650_v57 = vpop.xlane.xlu1 %2649 }
0x1da4   :  { %v2654_v60 = vmul.f32 0.03125, %v2650_v57 }
0x1da5   :  { %v2657_v61 = vsub.f32 %v2643_v48, %v2655_v3 }
0x1da6   :  { %v2656_v63 = vsub.f32 %v2642_v49, %v2654_v60  ;;  %v3259_v49 = vld [vmem:[%s4982_s17 + $0x1] ss:$0 sm:$0xff] }
0x1da7   :  { %v2659_v51 = vmul.f32 %v2657_v61, %v2657_v61 }
0x1da8   :  { %v2658_v1 = vmul.f32 %v2656_v63, %v2656_v63 }
0x1da9   :  { %v2663_v2 = vsel %vm243_vm3, %v2659_v51, 0.0 }
0x1daa   :  { %2664 = vadd.xlane.f32.xlu1 %v2663_v2  ;;  %v2660_v5 = vsel %vm243_vm3, %v2658_v1, 0.0 }
0x1dab   :  { %2661 = vadd.xlane.f32.xlu0 %v2660_v5 }
0x1e37   :  { %v2665_v9 = vpop.xlane.xlu1 %2664 }
0x1e38   :  { %v2667_v11 = vmul.f32 0.03125, %v2665_v9  ;;  %v2662_v12 = vpop.xlane.xlu0 %2661  ;;  %v2940_v9 = vld [vmem:[%s4985_s20] sm:$0xff] }
0x1e39   :  { %v2666_v14 = vmul.f32 0.03125, %v2662_v12 }
0x1e3a   :  { %v2669_v15 = vadd.f32 1e-12, %v2667_v11  ;;  %v2941_v11 = vld [vmem:[%s4985_s20 + $0x8] sm:$0xff] }
0x1e3b   :  { %v2668_v19 = vadd.f32 1e-12, %v2666_v14  ;;  %v3831_v12 = vpack.c.bf16 %v2941_v11, %v2940_v9  ;;  %v2942_v14 = vld [vmem:[%s4985_s20 + $0x10] sm:$0xff] }
0x1e3c   :  { %4028 = vrsqrt.f32 %v2669_v15  ;;  %v2943_v15 = vld [vmem:[%s4985_s20 + $0x18] sm:$0xff] }
0x1e3d   :  { %4030 = vrsqrt.f32 %v2668_v19  ;;  %3832 = vmatprep.subr.bf16.mxu1 %v3831_v12  ;;  %v3835_v19 = vpack.c.bf16 %v2943_v15, %v2942_v14 }
0x1e46   :  { %v4029_v24 = vpop.eup %4028 }
0x1e47   :  { %v4031_v0 = vpop.eup %4030  ;;  %v2673_v22 = vmul.f32 %v4029_v24, %v2657_v61 }
0x1e48   :  { %v2672_v62 = vmul.f32 %v4031_v0, %v2656_v63 }
0x1e49   :  { %v2681_v26 = vmul.f32 %v3240_v59, %v2673_v22 }
0x1e4a   :  { %v2680_v27 = vmul.f32 %v3240_v59, %v2672_v62 }
0x1e4b   :  { %v2689_v29 = vadd.f32 %v3241_v25, %v2681_v26 }
0x1e4c   :  { %v2688_v28 = vadd.f32 %v3241_v25, %v2680_v27  ;;  %v3264_v27 = vld [vmem:[%s4983_s18 + $0x1] ss:$0 sm:$0xff] }
0x1e4e   :  { %3622 = vmatprep.mubr.msk.f32.mxu1 %vm243_vm3, %v2688_v28 }
0x1e4f   :  { %3623 = vmatmul.mubr.msk.f32.vlgmr.msra.gmra.mrb[24].mxu1 %vm243_vm3, %v2689_v29 }
0x1e50   :  { %3834 = vmatpush3.bf16.msra.mxu1 %v3831_v12 }
0x1e51   :  { %3836 = vmatprep.subr.bf16.mxu1 %v3835_v19 }
0x1e54   :  { %3838 = vmatpush3.bf16.msra.mxu1 %v3835_v19 }
0x1f22   :  { %v3624_v40 = vpop.f32.mrb[24].mxu1 }
0x1f23   :  { %v2781_v58 = vadd.f32 %v3624_v40, %v3247_v39  ;;  %v2775_v41 = vpop.f32.mrb[25].mxu1  ;;  %v3034_v40 = vld [vmem:[%s5032_s25] sm:$0xff] }
0x1f24   :  { %v2776_v56 = vadd.f32 %v3247_v39, %v2775_v41  ;;  %v3039_v39 = vsel %vm3037_vm8, %v3035_v38, 0  ;;  %vm3036_vm9 = vcmp.ne.s32.totalorder %v3034_v40, 4294967196 }
0x1f25   :  { %v2787_v42 = vmul.f32 0.70710677, %v2781_v58  ;;  %v2785_v20 = vmul.f32 0.5, %v2781_v58  ;;  %v3038_v58 = vsel %vm3036_vm9, %v3034_v40, 0 }
0x1f26   :  { %v2786_v43 = vmul.f32 0.70710677, %v2776_v56  ;;  %v2784_v45 = vmul.f32 0.5, %v2776_v56 }
0x1f27   :  { %4032 = verf.f32 %v2787_v42 }
0x1f28   :  { %4034 = verf.f32 %v2786_v43 }
0x1f31   :  { %v4033_v44 = vpop.eup %4032 }
0x1f32   :  { %v4035_v33 = vpop.eup %4034  ;;  %v2791_v21 = vadd.f32 1.0, %v4033_v44 }
0x1f33   :  { %v2790_v46 = vadd.f32 1.0, %v4035_v33 }
0x1f34   :  { %v2793_v48 = vmul.f32 %v2791_v21, %v2785_v20 }
0x1f35   :  { %v2792_v47 = vmul.f32 %v2790_v46, %v2784_v45 }
0x1f37   :  { %3641 = vmatprep.mubr.msk.f32.mxu0 %vm150_vm0, %v2792_v47 }
0x1f38   :  { %3642 = vmatmul.mubr.msk.f32.vlgmr.msra.gmra.mrb[22].mxu0 %vm150_vm0, %v2793_v48 }
0x200b   :  { %v3643_v52 = vpop.f32.mrb[22].mxu0 }
0x200c   :  { %v2889_v53 = vadd.f32 %v3643_v52, %v3259_v49  ;;  %v2883_v55 = vpop.f32.mrb[23].mxu0 }
0x200d   :  { %v2884_v3 = vadd.f32 %v3259_v49, %v2883_v55  ;;  %v3272_v55 = vsel %vm3037_vm8, 1.0, %v4199_v18 }
0x200e   :  { %v2893_v57 = vadd.f32 %v2889_v53, %v2689_v29  ;;  %v3271_v53 = vsel %vm3036_vm9, 1.0, %v4199_v18 }
0x200f   :  { %v2892_v60 = vadd.f32 %v2884_v3, %v2688_v28  ;;  %v3099_v3 = vsel %vm3086_vm12, %v3271_v53, 0.0 }
0x2010   :  { %v2901_v61 = vsel %vm243_vm3, %v2893_v57, 0.0 }
0x2011   :  { %2902 = vadd.xlane.f32.xlu1 %v2901_v61  ;;  %v2898_v63 = vsel %vm243_vm3, %v2892_v60, 0.0 }
0x2012   :  { %2899 = vadd.xlane.f32.xlu0 %v2898_v63 }
0x209e   :  { %v2903_v51 = vpop.xlane.xlu1 %2902 }
0x209f   :  { %v2905_v1 = vmul.f32 0.03125, %v2903_v51  ;;  %v2900_v2 = vpop.xlane.xlu0 %2899 }
0x20a0   :  { %v2904_v5 = vmul.f32 0.03125, %v2900_v2 }
0x20a1   :  { %v2907_v54 = vsub.f32 %v2893_v57, %v2905_v1  ;;  %v3100_v57 = vsel %vm3086_vm12, %v3272_v55, 0.0 }
0x20a2   :  { %v2906_v50 = vsub.f32 %v2892_v60, %v2904_v5  ;;  %v3101_v60 = vadd.f32 %v3100_v57, %v3099_v3 }
0x20a3   :  { %v2909_v4 = vmul.f32 %v2907_v54, %v2907_v54 }
0x20a4   :  { %v2908_v10 = vmul.f32 %v2906_v50, %v2906_v50 }
0x20a5   :  { %v2913_v7 = vsel %vm243_vm3, %v2909_v4, 0.0 }
0x20a6   :  { %2914 = vadd.xlane.f32.xlu1 %v2913_v7  ;;  %v2910_v8 = vsel %vm243_vm3, %v2908_v10, 0.0 }
0x20a7   :  { %2911 = vadd.xlane.f32.xlu0 %v2910_v8 }
0x2133   :  { %v2915_v24 = vpop.xlane.xlu1 %2914 }
0x2134   :  { %v2917_v59 = vmul.f32 0.03125, %v2915_v24  ;;  %v2912_v0 = vpop.xlane.xlu0 %2911 }
0x2135   :  { %v2916_v22 = vmul.f32 0.03125, %v2912_v0 }
0x2136   :  { %v2919_v62 = vadd.f32 1e-12, %v2917_v59 }
0x2137   :  { %v2918_v25 = vadd.f32 1e-12, %v2916_v22 }
0x2138   :  { %4036 = vrsqrt.f32 %v2919_v62 }
0x2139   :  { %4038 = vrsqrt.f32 %v2918_v25 }
0x2142   :  { %v4037_v26 = vpop.eup %4036 }
0x2143   :  { %v4039_v28 = vpop.eup %4038  ;;  %v2923_v29 = vmul.f32 %v4037_v26, %v2907_v54 }
0x2144   :  { %v2922_v30 = vmul.f32 %v4039_v28, %v2906_v50 }
0x2145   :  { %v2931_v23 = vmul.f32 %v3264_v27, %v2923_v29 }
0x2146   :  { %v2930_v34 = vmul.f32 %v3264_v27, %v2922_v30 }
0x2147   :  { %v2939_v6 = vadd.f32 %v3265_v31, %v2931_v23 }
0x2148   :  { %v2938_v35 = vadd.f32 %v3265_v31, %v2930_v34 }
0x214a   :  { %3652 = vmatprep.mubr.msk.f32.mxu1 %vm243_vm3, %v2938_v35 }
0x214b   :  { %3653 = vmatmul.mubr.msk.f32.vlgmr.msra.gmra.mrb[26].mxu1 %vm243_vm3, %v2939_v6 }
0x221e   :  { %v3654_v36 = vpop.f32.mrb[26].mxu1 }
0x221f   :  { %v3029_v13 = vadd.f32 %v3654_v36, %v3266_v32  ;;  %v3023_v37 = vpop.f32.mrb[27].mxu1 }
0x2220   :  { %v3024_v17 = vadd.f32 %v3266_v32, %v3023_v37 }
0x2221   :  { %3033 = vst [vmem:[#allocation10 + $0x8] sm:$0xff] %v3029_v13  ;;  %3042 = vmax.xlane.f32.xlu1 %v3029_v13 }
0x2222   :  { %3032 = vst [vmem:[#allocation10] sm:$0xff] %v3024_v17  ;;  %3040 = vmax.xlane.f32.xlu0 %v3024_v17 }
0x2232   :  { %3064 = vperm.xlu1 %3947, %v3039_v39  }
0x2238   :  { %3061 = vperm.xlu0 %3866, %v3038_v58  }
0x22ae   :  { %v3043_v41 = vpop.xlane.xlu1 %3042 }
0x22af   :  { %v3045_v56 = vsub.f32 %v3029_v13, %v3043_v41  ;;  %v3041_v42 = vpop.xlane.xlu0 %3040 }
0x22b0   :  { %v3044_v43 = vsub.f32 %v3024_v17, %v3041_v42 }
0x22b1   :  { %v3048_v44 = vmul.f32 1.442695, %v3045_v56 }
0x22b2   :  { %v3046_v33 = vmul.f32 1.442695, %v3044_v43  ;;  %v3065_v45 = vpop.permute.xlu1 %3064 }
0x22b3   :  { %4040 = vpow2.f32 %v3048_v44  ;;  %vm3067_vm11 = vcmp.eq.s32.totalorder %v3065_v45, %v4423_v16 }
0x22b4   :  { %4042 = vpow2.f32 %v3046_v33  ;;  %v3270_v48 = vsel %vm3067_vm11, 1.0, %v4199_v18 }
0x22b5   :  { %v3073_v52 = vmul.f32 %v3270_v48, %v3029_v13 }
0x22b7   :  { %v3062_v21 = vpop.permute.xlu0 %3061 }
0x22b8   :  { %vm3066_vm10 = vcmp.eq.s32.totalorder %v3062_v21, %v4423_v16 }
0x22b9   :  { %v3269_v20 = vsel %vm3066_vm10, 1.0, %v4199_v18 }
0x22ba   :  { %v3072_v49 = vmul.f32 %v3269_v20, %v3024_v17 }
0x22bd   :  { %v4041_v46 = vpop.eup %4040 }
0x22be   :  { %v4043_v47 = vpop.eup %4042  ;;  %3052 = vadd.xlane.f32.xlu0 %v4041_v46 }
0x22bf   :  { %3050 = vadd.xlane.f32.xlu1 %v4043_v47 }
0x22c2   :  { %3074 = vadd.xlane.f32.xlu0 %v3072_v49 }
0x22c3   :  { %3076 = vadd.xlane.f32.xlu1 %v3073_v52 }
0x22c7   :  { %3102 = vadd.xlane.f32.xlu1 %v3101_v60 }
0x234b   :  { %v3053_v61 = vpop.xlane.xlu0 %3052 }
0x234c   :  { %4044 = vlog2.f32 %v3053_v61  ;;  %v3051_v63 = vpop.xlane.xlu1 %3050 }
0x234d   :  { %4046 = vlog2.f32 %v3051_v63 }
0x234f   :  { %v3075_v10 = vpop.xlane.xlu0 %3074 }
0x2350   :  { %v3077_v4 = vpop.xlane.xlu1 %3076 }
0x2356   :  { %v4045_v51 = vpop.eup %4044 }
0x2357   :  { %v4047_v1 = vpop.eup %4046  ;;  %v3057_v2 = vmul.f32 0.6931472, %v4045_v51 }
0x2358   :  { %v3055_v5 = vmul.f32 0.6931472, %v4047_v1 }
0x2359   :  { %v3059_v54 = vadd.f32 %v3057_v2, %v3043_v41 }
0x235a   :  { %v3058_v50 = vadd.f32 %v3055_v5, %v3041_v42 }
0x235b   :  { %v3083_v7 = vsub.f32 %v3059_v54, %v3077_v4 }
0x235c   :  { %v3082_v18 = vsub.f32 %v3058_v50, %v3075_v10 }
0x235d   :  { %v3085_v8 = vmul.f32 %v3272_v55, %v3083_v7 }
0x235e   :  { %v3084_v9 = vmul.f32 %v3271_v53, %v3082_v18 }
0x235f   :  { %v3088_v11 = vsel %vm3086_vm12, %v3085_v8, 0.0 }
0x2360   :  { %v3087_v12 = vsel %vm3086_vm12, %v3084_v9, 0.0 }
0x2361   :  { %v3089_v14 = vadd.f32 %v3088_v11, %v3087_v12 }
0x2363   :  { %3090 = vadd.xlane.f32.xlu0 %v3089_v14 }
0x2364   :  { %4149 = shalt.err (!%p4146_p8)
}
0x2365   :  { %s5033_s1 = sld [smem:[#allocation27_spill]] }
0x236b   :  { %s4150_s8 = scalar_lea.hbm %s5033_s1, 256 }
0x236c   :  { %p4151_p9 = scmp.ne.s32.totalorder %s5033_s1, %s4150_s8  ;;  %p4154_p10 = scmp.lt.u32.totalorder %s4150_s8, %s5033_s1 }
0x236e   :  { %p4156_p11 = pnand %p4154_p10, %p4151_p9 }
0x2370   :  { %4159 = shalt.err (!%p4156_p11)
}
0x2371   :  { %s5034_s23 = smov 128   ;;  %v3103_v15 = vpop.xlane.xlu1 %3102  ;;  %vm3112_vm13 = vcmp.eq.s32.totalorder %v4423_v16, 1  ;;  %vm3111_vm14 = vcmp.eq.s32.totalorder %v4423_v16, 0 }
0x2372   :  { %3129 = dma.vmem_to_hbm [thread:$0]  %s3124_s30, 256, %s5033_s1, [#allocation4], %s5034_s23, %s5034_s23, %s5028_s21   ;;  %v3104_v19 = vrot.slane %v3103_v15, 4 }
0x2373   :  { %s4214_s21 = smov [#allocation11]  }
0x2374   :  { %v3105_v24 = vadd.f32 %v3104_v19, %v3103_v15  ;;  %s3136_s14 = sshll.u32 %s4214_s21, 4  ;;  %s3137_s14 = int_to_ptr.vmem [resolvable:$true] %s3136_s14 }
0x2375   :  { %s4160_s5 = scalar_lea.vmem %s3137_s14, 16  ;;  %s4164_s22 = scalar_lea.vmem %s3137_s14, 32 }
0x2376   :  { %v3106_v59 = vrot.slane %v3105_v24, 2  ;;  %p4161_p12 = scmp.ne.s32.totalorder %s3137_s14, %s4160_s5  ;;  %p4165_p13 = scmp.lt.s32.totalorder %s3137_s14, %s3137_s14 }
0x2377   :  { %p4166_p0 = scmp.lt.s32.totalorder %s4164_s22, %s4160_s5 }
0x2378   :  { %v3107_v25 = vadd.f32 %v3106_v59, %v3105_v24 }
0x2379   :  { %p4167_p1 = por %p4166_p0, %p4165_p13 }
0x237a   :  { %v3108_v28 = vrot.slane %v3107_v25, 1 }
0x237b   :  { %p4168_p2 = pnand %p4167_p1, %p4161_p12 }
0x237c   :  { %v3109_v31 = vadd.f32 %v3108_v28, %v3107_v25 }
0x23f0   :  { %v3091_v0 = vpop.xlane.xlu0 %3090 }
0x23f1   :  { %v3092_v22 = vrot.slane %v3091_v0, 4 }
0x23f3   :  { %v3093_v62 = vadd.f32 %v3092_v22, %v3091_v0 }
0x23f5   :  { %v3094_v26 = vrot.slane %v3093_v62, 2 }
0x23f7   :  { %v3095_v27 = vadd.f32 %v3094_v26, %v3093_v62 }
0x23f9   :  { %v3096_v29 = vrot.slane %v3095_v27, 1 }
0x23fb   :  { %v3097_v30 = vadd.f32 %v3096_v29, %v3095_v27 }
0x23fd   :  { %3839 = vpush %v3097_v30 }
0x23fe   :  { %3841 = vpush %v3109_v31 }
0x242e   :  { %s3840_s27 = spop %3839 }
0x242f   :  { %v3115_v23 = vstv %s3840_s27  ;;  %s3842_s6 = spop %3841 }
0x2430   :  { %v3113_v34 = vstv %s3842_s6 }
0x2431   :  { %v3114_v35 = vsel %vm3112_vm13, %v3113_v34, 0.0 }
0x2432   :  { %v3116_v6 = vsel %vm3111_vm14, %v3115_v23, %v3114_v35 }
0x2433   :  { %3117 = vst [vmem:[#allocation11] sm:$0x1] %v3116_v6 }
0x2434   :  { %4171 = shalt.err (!%p4168_p2)
}
0x2435   :  { %s5035_s2 = sld [smem:[#allocation28_spill]] }
0x243b   :  { %s4172_s13 = scalar_lea.hbm %s5035_s2, 16 }
0x243c   :  { %p4173_p3 = scmp.ne.s32.totalorder %s5035_s2, %s4172_s13  ;;  %p4176_p4 = scmp.lt.u32.totalorder %s4172_s13, %s5035_s2 }
0x243e   :  { %p4178_p5 = pnand %p4176_p4, %p4173_p3 }
0x2440   :  { %4181 = shalt.err (!%p4178_p5)
}
0x2441   :  { %3139 = dma.vmem_to_hbm [thread:$0]  %s3137_s14, 16, %s5035_s2, [#allocation12]  }
0x2442   :  { %4188 = dma.done.wait [#allocation4], 256  }
0x2443   :  { %4189 = vsyncadd [#allocation4], 4294967040 }
0x2444   :  { %4190 = dma.done.wait [#allocation12], 16  }
0x2445   :  { %4191 = vsyncadd [#allocation12], 4294967280 }
0x2446   :  { %3146 = vsyncpa [#allocation3], 1 }
0x2447   :  { %3147 = vsyncpa [#allocation6], 1 }
0x2448   :  { %3148 = vsyncpa [#allocation9], 1 }
0x2449   :  { %3149 = vsyncpa [#allocation4], 1 }
0x244a   :  { %3150 = vsyncpa [#allocation12], 1 }

</bundles_post_ra>
